<compile_context>
chip_gen: v7x
topology: tpu7x:2x2x1
jax: 0.10.0
libtpu: 0.0.40
codegen_flags: <defaults>
</compile_context>

<pallas_src>
import functools

import jax
import jax.numpy as jnp
from jax import lax
from jax.experimental import pallas as pl
from jax.experimental.pallas import tpu as pltpu


def _act(x, non_linear):
    if non_linear == "RE":
        return jnp.maximum(x, 0.0)
    # HardSwish: x * relu6(x + 3) / 6
    return x * jnp.clip(x + 3.0, 0.0, 6.0) * (1.0 / 6.0)


# ---------------- fused kernel ----------------

def _basic_unit_kernel(x_ref, w1_ref, s1_ref, b1_ref, w2_ref, s2_ref, b2_ref,
                       w3_ref, b3_ref, o_ref, pad_ref, acc_ref, *,
                       k, pad, H, W, non_linear):
    e = pl.program_id(1)
    n_e = pl.num_programs(1)
    C = x_ref.shape[1]
    TE = w1_ref.shape[0]
    HW = H * W

    # Input image, channels-first, spatial flattened onto the lane axis.
    x2d = x_ref[0].reshape(C, HW)                               # (C, H*W) f32

    # ---- stage 1: 1x1 expand (MXU, lane-dense over H*W) + BN + act -------
    h1 = jnp.dot(w1_ref[...], x2d.astype(jnp.bfloat16),
                 preferred_element_type=jnp.float32)            # (TE, H*W)
    h1 = _act(h1 * s1_ref[...] + b1_ref[...], non_linear)

    # ---- stage 2: depthwise k x k + BN + act ------------------------------
    # Zero the padded scratch once per image; the interior is always fully
    # overwritten below and the halo is never written, so it stays zero.
    @pl.when(e == 0)
    def _():
        pad_ref[...] = jnp.zeros_like(pad_ref)

    pad_ref[:, pad:pad + H, pad:pad + W] = h1.reshape(TE, H, W)

    w2 = w2_ref[...]                                            # (TE, k*k)
    acc = jnp.zeros((TE, H, W), jnp.float32)
    for i in range(k):
        for j in range(k):
            idx = i * k + j
            tap = w2[:, idx:idx + 1][:, :, None]                # (TE, 1, 1)
            acc = acc + pad_ref[:, i:i + H, j:j + W] * tap
    h2 = _act(acc * s2_ref[...][:, :, None] + b2_ref[...][:, :, None],
              non_linear)                                       # (TE, H, W)

    # ---- stage 3: 1x1 project, accumulated across E-tiles + residual -----
    @pl.when(e == 0)
    def _():
        acc_ref[...] = x2d + b3_ref[...]                        # residual + bias

    partial = lax.dot_general(
        w3_ref[...], h2.reshape(TE, HW).astype(jnp.bfloat16),
        (((0,), (0,)), ((), ())),
        preferred_element_type=jnp.float32)                     # (C, H*W)
    acc_ref[...] += partial

    @pl.when(e == n_e - 1)
    def _():
        o_ref[...] = acc_ref[...].reshape(1, C, H, W)


# ---------------- wrapper ----------------

def _pick_tile_e(E):
    if E % 8 != 0:
        return E
    for t in (64, 48, 32, 24, 16, 8):
        if E % t == 0 and E // t >= 2:
            return t
    return E


def basic_unit_pallas(x_nchw, p, kernel_size, non_linear, tile_e=None):
    k = kernel_size
    pad = 1 if k == 3 else 2
    N, C, H, W = x_nchw.shape
    E = p["w1"].shape[1]
    f32, bf16 = jnp.float32, jnp.bfloat16

    if tile_e is None:
        tile_e = _pick_tile_e(E)
    assert E % tile_e == 0, (E, tile_e)
    ge = E // tile_e
    Hp, Wp = H + 2 * pad, W + 2 * pad

    x = x_nchw.astype(f32)
    # conv1 weight as (E, C): rows = expanded channels (tiled over grid axis 1).
    w1t = jnp.transpose(p["w1"], (1, 0)).astype(bf16)                 # (E, C)
    s1 = p["s1"].reshape(E, 1).astype(f32)
    b1 = p["b1"].reshape(E, 1).astype(f32)
    # depthwise taps as (E, k*k):  w2r[e, i*k+j] == w2[i, j, e]
    w2r = jnp.transpose(p["w2"], (2, 0, 1)).reshape(E, k * k).astype(f32)
    s2 = p["s2"].reshape(E, 1).astype(f32)
    b2 = p["b2"].reshape(E, 1).astype(f32)
    # conv3 weight (E, C) with its BN scale folded in; bias kept separate.
    w3s = (p["w3"] * p["s3"][None, :]).astype(bf16)                   # (E, C)
    b3 = p["b3"].reshape(C, 1).astype(f32)

    kernel = functools.partial(_basic_unit_kernel, k=k, pad=pad, H=H, W=W,
                               non_linear=non_linear)

    return pl.pallas_call(
        kernel,
        out_shape=jax.ShapeDtypeStruct((N, C, H, W), f32),
        grid_spec=pltpu.PrefetchScalarGridSpec(
            num_scalar_prefetch=0,
            grid=(N, ge),
            in_specs=[
                pl.BlockSpec((1, C, H, W), lambda n, e: (n, 0, 0, 0)),   # x
                pl.BlockSpec((tile_e, C), lambda n, e: (e, 0)),          # w1t
                pl.BlockSpec((tile_e, 1), lambda n, e: (e, 0)),          # s1
                pl.BlockSpec((tile_e, 1), lambda n, e: (e, 0)),          # b1
                pl.BlockSpec((tile_e, k * k), lambda n, e: (e, 0)),      # w2r
                pl.BlockSpec((tile_e, 1), lambda n, e: (e, 0)),          # s2
                pl.BlockSpec((tile_e, 1), lambda n, e: (e, 0)),          # b2
                pl.BlockSpec((tile_e, C), lambda n, e: (e, 0)),          # w3s
                pl.BlockSpec((C, 1), lambda n, e: (0, 0)),               # b3
            ],
            out_specs=pl.BlockSpec((1, C, H, W), lambda n, e: (n, 0, 0, 0)),
            scratch_shapes=[
                pltpu.VMEM((tile_e, Hp, Wp), f32),   # padded expanded-act tile
                pltpu.VMEM((C, H * W), f32),         # conv3 accumulator (+res)
            ],
        ),
        compiler_params=pltpu.CompilerParams(
            dimension_semantics=("parallel", "arbitrary")),
    )(x, w1t, s1, b1, w2r, s2, b2, w3s, b3)


# ---------------- pure-JAX reference (NCHW, matches PyTorch semantics) ----------------

def basic_unit_ref(x, p, k, non_linear):
    pad = 1 if k == 3 else 2

    y = jnp.einsum("nchw,ce->nehw", x, p["w1"])
    y = y * p["s1"][None, :, None, None] + p["b1"][None, :, None, None]
    y = _act(y, non_linear)

    yp = jnp.pad(y, ((0, 0), (0, 0), (pad, pad), (pad, pad)))
    H, W = y.shape[2], y.shape[3]
    acc = jnp.zeros_like(y)
    for i in range(k):
        for j in range(k):
            acc = acc + yp[:, :, i:i + H, j:j + W] * p["w2"][i, j, :][None, :, None, None]
    y = _act(acc * p["s2"][None, :, None, None] + p["b2"][None, :, None, None],
             non_linear)

    z = jnp.einsum("nehw,eo->nohw", y, p["w3"])
    z = z * p["s3"][None, :, None, None] + p["b3"][None, :, None, None]
    return z + x


# ---------------- deterministic parameter construction ----------------

def make_params(key, in_channels, exp_size, kernel_size):
    eps = 1e-5
    ks = jax.random.split(key, 16)
    f32 = jnp.float32

    def fold(conv_bias, gamma, beta, mean, var):
        scale = gamma / jnp.sqrt(var + eps)
        bias = (conv_bias - mean) * scale + beta
        return scale.astype(f32), bias.astype(f32)

    # conv1: 1x1, in -> exp   (stored as [Cin, E] matmul weight)
    w1 = 0.1 * jax.random.normal(ks[0], (in_channels, exp_size), f32)
    cb1 = 0.05 * jax.random.normal(ks[1], (exp_size,), f32)
    s1, b1 = fold(
        cb1,
        0.5 + jax.random.uniform(ks[2], (exp_size,), f32),
        0.1 * jax.random.normal(ks[3], (exp_size,), f32),
        0.1 * jax.random.normal(ks[4], (exp_size,), f32),
        0.5 + jax.random.uniform(ks[5], (exp_size,), f32),
    )

    # conv2: depthwise kxk, groups=exp  (stored as [k, k, E])
    w2 = 0.1 * jax.random.normal(ks[6], (kernel_size, kernel_size, exp_size), f32)
    cb2 = 0.05 * jax.random.normal(ks[7], (exp_size,), f32)
    s2, b2 = fold(
        cb2,
        0.5 + jax.random.uniform(ks[8], (exp_size,), f32),
        0.1 * jax.random.normal(ks[9], (exp_size,), f32),
        0.1 * jax.random.normal(ks[10], (exp_size,), f32),
        0.5 + jax.random.uniform(ks[11], (exp_size,), f32),
    )

    # conv3: 1x1, exp -> out  (stored as [E, Cout])
    w3 = 0.1 * jax.random.normal(ks[12], (exp_size, in_channels), f32)
    cb3 = 0.05 * jax.random.normal(ks[13], (in_channels,), f32)
    s3, b3 = fold(
        cb3,
        0.5 + jax.random.uniform(ks[14], (in_channels,), f32),
        0.1 * jax.random.normal(ks[15], (in_channels,), f32),
        0.1 * jax.random.normal(jax.random.fold_in(key, 100), (in_channels,), f32),
        0.5 + jax.random.uniform(jax.random.fold_in(key, 101), (in_channels,), f32),
    )

    return dict(w1=w1, s1=s1, b1=b1, w2=w2, s2=s2, b2=b2, w3=w3, s3=s3, b3=b3)


if __name__ == "__main__":
    # BasicUnit(in_channels=8, out_channels=8, exp_size=16, kernel_size=3, non_linear='HS')
    N, C, H, W = 2, 8, 8, 8
    E, K, NL = 16, 3, "HS"

    key = jax.random.PRNGKey(0)
    kx, kp = jax.random.split(key)
    x = jax.random.normal(kx, (N, C, H, W), jnp.float32)  # NCHW, like PyTorch
    params = make_params(kp, C, E, K)

    out = basic_unit_pallas(x, params, K, NL)
    out = jax.block_until_ready(out)

    ref = basic_unit_ref(x, params, K, NL)
    assert out.shape == (N, C, H, W)
    err = float(jnp.max(jnp.abs(out - ref)))
    # bf16 matmul inputs (f32 accumulation) vs f32 reference => relaxed tolerance.
    assert jnp.allclose(out, ref, atol=2e-2, rtol=2e-2), err

    print("KERNEL_OK")
</pallas_src>

<mosaic_0001>
module attributes {stable_mosaic.version = 11 : i64} {
  func.func @_basic_unit_kernel(%arg0: i32, %arg1: i32, %arg2: memref<1x8x8x8xf32, #tpu.memory_space<vmem>>, %arg3: memref<8x8xbf16, #tpu.memory_space<vmem>>, %arg4: memref<8x1xf32, #tpu.memory_space<vmem>>, %arg5: memref<8x1xf32, #tpu.memory_space<vmem>>, %arg6: memref<8x9xf32, #tpu.memory_space<vmem>>, %arg7: memref<8x1xf32, #tpu.memory_space<vmem>>, %arg8: memref<8x1xf32, #tpu.memory_space<vmem>>, %arg9: memref<8x8xbf16, #tpu.memory_space<vmem>>, %arg10: memref<8x1xf32, #tpu.memory_space<vmem>>, %arg11: memref<1x8x8x8xf32, #tpu.memory_space<vmem>>, %arg12: memref<8x10x10xf32, #tpu.memory_space<vmem>>, %arg13: memref<8x64xf32, #tpu.memory_space<vmem>>) attributes {dimension_semantics = [#tpu.dimension_semantics<parallel>, #tpu.dimension_semantics<arbitrary>], iteration_bounds = array<i64: 2, 2>, scalar_prefetch = 0 : i64, scratch_operands = 2 : i64, tpu.core_type = #tpu.core_type<tc>, window_params = [{transform_indices = @transform_0, window_bounds = array<i64: 1, 8, 8, 8>}, {transform_indices = @transform_1, window_bounds = array<i64: 8, 8>}, {transform_indices = @transform_2, window_bounds = array<i64: 8, 1>}, {transform_indices = @transform_3, window_bounds = array<i64: 8, 1>}, {transform_indices = @transform_4, window_bounds = array<i64: 8, 9>}, {transform_indices = @transform_5, window_bounds = array<i64: 8, 1>}, {transform_indices = @transform_6, window_bounds = array<i64: 8, 1>}, {transform_indices = @transform_7, window_bounds = array<i64: 8, 8>}, {pipeline_mode = #tpu.pipeline_mode<synchronous>, transform_indices = @transform_8, window_bounds = array<i64: 8, 1>}, {transform_indices = @transform_9, window_bounds = array<i64: 1, 8, 8, 8>}]} {
    %c0 = arith.constant 0 : index
    %c0_0 = arith.constant 0 : index
    %c0_1 = arith.constant 0 : index
    %c0_2 = arith.constant 0 : index
    %0 = vector.load %arg2[%c0, %c0_0, %c0_1, %c0_2] : memref<1x8x8x8xf32, #tpu.memory_space<vmem>>, vector<1x8x8x8xf32>
    %1 = vector.shape_cast %0 : vector<1x8x8x8xf32> to vector<8x8x8xf32>
    %2 = vector.shape_cast %1 : vector<8x8x8xf32> to vector<8x64xf32>
    %c0_3 = arith.constant 0 : index
    %c0_4 = arith.constant 0 : index
    %3 = vector.load %arg3[%c0_3, %c0_4] : memref<8x8xbf16, #tpu.memory_space<vmem>>, vector<8x8xbf16>
    %4 = arith.truncf %2 : vector<8x64xf32> to vector<8x64xbf16>
    %cst = arith.constant dense<0.000000e+00> : vector<8x64xf32>
    %5 = tpu.matmul %3, %4, %cst {dimension_numbers = #tpu.dot_dimension_numbers<[1], [0], [0], [1], [0, 0, 1, 1], [], []>} : vector<8x8xbf16>, vector<8x64xbf16>, vector<8x64xf32> -> vector<8x64xf32>
    %c0_5 = arith.constant 0 : index
    %c0_6 = arith.constant 0 : index
    %6 = vector.load %arg4[%c0_5, %c0_6] : memref<8x1xf32, #tpu.memory_space<vmem>>, vector<8x1xf32>
    %7 = vector.broadcast %6 : vector<8x1xf32> to vector<8x64xf32>
    %8 = arith.mulf %5, %7 : vector<8x64xf32>
    %c0_7 = arith.constant 0 : index
    %c0_8 = arith.constant 0 : index
    %9 = vector.load %arg5[%c0_7, %c0_8] : memref<8x1xf32, #tpu.memory_space<vmem>>, vector<8x1xf32>
    %10 = vector.broadcast %9 : vector<8x1xf32> to vector<8x64xf32>
    %11 = arith.addf %8, %10 : vector<8x64xf32>
    %cst_9 = arith.constant 3.000000e+00 : f32
    %12 = vector.broadcast %cst_9 : f32 to vector<8x64xf32>
    %13 = arith.addf %11, %12 : vector<8x64xf32>
    %cst_10 = arith.constant 0.000000e+00 : f32
    %cst_11 = arith.constant 6.000000e+00 : f32
    %14 = vector.broadcast %cst_10 : f32 to vector<8x64xf32>
    %15 = arith.maximumf %14, %13 : vector<8x64xf32>
    %16 = vector.broadcast %cst_11 : f32 to vector<8x64xf32>
    %17 = arith.minimumf %16, %15 : vector<8x64xf32>
    %18 = arith.mulf %11, %17 : vector<8x64xf32>
    %cst_12 = arith.constant 0.166666672 : f32
    %19 = vector.broadcast %cst_12 : f32 to vector<8x64xf32>
    %20 = arith.mulf %18, %19 : vector<8x64xf32>
    %c0_i32 = arith.constant 0 : i32
    %21 = arith.cmpi eq, %arg1, %c0_i32 : i32
    %22 = arith.extui %21 : i1 to i32
    %c0_i32_13 = arith.constant 0 : i32
    %23 = arith.cmpi ne, %22, %c0_i32_13 : i32
    scf.if %23 {
      %cst_63 = arith.constant 0.000000e+00 : f32
      %112 = vector.broadcast %cst_63 : f32 to vector<8x10x10xf32>
      %c0_64 = arith.constant 0 : index
      %c0_65 = arith.constant 0 : index
      %c0_66 = arith.constant 0 : index
      %113 = vector.load %arg12[%c0_64, %c0_65, %c0_66] : memref<8x10x10xf32, #tpu.memory_space<vmem>>, vector<8x10x10xf32>
      tpu.vector_store %arg12[%c0_64, %c0_65, %c0_66], %112 {strides = array<i32>} : memref<8x10x10xf32, #tpu.memory_space<vmem>>, vector<8x10x10xf32>,
    } else {
    }
    %24 = vector.shape_cast %20 : vector<8x64xf32> to vector<8x8x8xf32>
    %c0_14 = arith.constant 0 : index
    %c1 = arith.constant 1 : index
    %c1_15 = arith.constant 1 : index
    %25 = vector.load %arg12[%c0_14, %c1, %c1_15] : memref<8x10x10xf32, #tpu.memory_space<vmem>>, vector<8x8x8xf32>
    tpu.vector_store %arg12[%c0_14, %c1, %c1_15], %24 {strides = array<i32>} : memref<8x10x10xf32, #tpu.memory_space<vmem>>, vector<8x8x8xf32>,
    %c0_16 = arith.constant 0 : index
    %c0_17 = arith.constant 0 : index
    %26 = vector.load %arg6[%c0_16, %c0_17] : memref<8x9xf32, #tpu.memory_space<vmem>>, vector<8x9xf32>
    %cst_18 = arith.constant 0.000000e+00 : f32
    %27 = vector.broadcast %cst_18 : f32 to vector<8x8x8xf32>
    %28 = vector.extract_strided_slice %26 {offsets = [0, 0], sizes = [8, 1], strides = [1, 1]} : vector<8x9xf32> to vector<8x1xf32>
    %29 = vector.shape_cast %28 : vector<8x1xf32> to vector<8x1x1xf32>
    %c0_19 = arith.constant 0 : index
    %c0_20 = arith.constant 0 : index
    %c0_21 = arith.constant 0 : index
    %30 = vector.load %arg12[%c0_19, %c0_20, %c0_21] : memref<8x10x10xf32, #tpu.memory_space<vmem>>, vector<8x8x8xf32>
    %31 = vector.broadcast %29 : vector<8x1x1xf32> to vector<8x8x8xf32>
    %32 = arith.mulf %30, %31 : vector<8x8x8xf32>
    %33 = arith.addf %27, %32 : vector<8x8x8xf32>
    %34 = vector.extract_strided_slice %26 {offsets = [0, 1], sizes = [8, 1], strides = [1, 1]} : vector<8x9xf32> to vector<8x1xf32>
    %35 = vector.shape_cast %34 : vector<8x1xf32> to vector<8x1x1xf32>
    %c0_22 = arith.constant 0 : index
    %c0_23 = arith.constant 0 : index
    %c1_24 = arith.constant 1 : index
    %36 = vector.load %arg12[%c0_22, %c0_23, %c1_24] : memref<8x10x10xf32, #tpu.memory_space<vmem>>, vector<8x8x8xf32>
    %37 = vector.broadcast %35 : vector<8x1x1xf32> to vector<8x8x8xf32>
    %38 = arith.mulf %36, %37 : vector<8x8x8xf32>
    %39 = arith.addf %33, %38 : vector<8x8x8xf32>
    %40 = vector.extract_strided_slice %26 {offsets = [0, 2], sizes = [8, 1], strides = [1, 1]} : vector<8x9xf32> to vector<8x1xf32>
    %41 = vector.shape_cast %40 : vector<8x1xf32> to vector<8x1x1xf32>
    %c0_25 = arith.constant 0 : index
    %c0_26 = arith.constant 0 : index
    %c2 = arith.constant 2 : index
    %42 = vector.load %arg12[%c0_25, %c0_26, %c2] : memref<8x10x10xf32, #tpu.memory_space<vmem>>, vector<8x8x8xf32>
    %43 = vector.broadcast %41 : vector<8x1x1xf32> to vector<8x8x8xf32>
    %44 = arith.mulf %42, %43 : vector<8x8x8xf32>
    %45 = arith.addf %39, %44 : vector<8x8x8xf32>
    %46 = vector.extract_strided_slice %26 {offsets = [0, 3], sizes = [8, 1], strides = [1, 1]} : vector<8x9xf32> to vector<8x1xf32>
    %47 = vector.shape_cast %46 : vector<8x1xf32> to vector<8x1x1xf32>
    %c0_27 = arith.constant 0 : index
    %c1_28 = arith.constant 1 : index
    %c0_29 = arith.constant 0 : index
    %48 = vector.load %arg12[%c0_27, %c1_28, %c0_29] : memref<8x10x10xf32, #tpu.memory_space<vmem>>, vector<8x8x8xf32>
    %49 = vector.broadcast %47 : vector<8x1x1xf32> to vector<8x8x8xf32>
    %50 = arith.mulf %48, %49 : vector<8x8x8xf32>
    %51 = arith.addf %45, %50 : vector<8x8x8xf32>
    %52 = vector.extract_strided_slice %26 {offsets = [0, 4], sizes = [8, 1], strides = [1, 1]} : vector<8x9xf32> to vector<8x1xf32>
    %53 = vector.shape_cast %52 : vector<8x1xf32> to vector<8x1x1xf32>
    %c0_30 = arith.constant 0 : index
    %c1_31 = arith.constant 1 : index
    %c1_32 = arith.constant 1 : index
    %54 = vector.load %arg12[%c0_30, %c1_31, %c1_32] : memref<8x10x10xf32, #tpu.memory_space<vmem>>, vector<8x8x8xf32>
    %55 = vector.broadcast %53 : vector<8x1x1xf32> to vector<8x8x8xf32>
    %56 = arith.mulf %54, %55 : vector<8x8x8xf32>
    %57 = arith.addf %51, %56 : vector<8x8x8xf32>
    %58 = vector.extract_strided_slice %26 {offsets = [0, 5], sizes = [8, 1], strides = [1, 1]} : vector<8x9xf32> to vector<8x1xf32>
    %59 = vector.shape_cast %58 : vector<8x1xf32> to vector<8x1x1xf32>
    %c0_33 = arith.constant 0 : index
    %c1_34 = arith.constant 1 : index
    %c2_35 = arith.constant 2 : index
    %60 = vector.load %arg12[%c0_33, %c1_34, %c2_35] : memref<8x10x10xf32, #tpu.memory_space<vmem>>, vector<8x8x8xf32>
    %61 = vector.broadcast %59 : vector<8x1x1xf32> to vector<8x8x8xf32>
    %62 = arith.mulf %60, %61 : vector<8x8x8xf32>
    %63 = arith.addf %57, %62 : vector<8x8x8xf32>
    %64 = vector.extract_strided_slice %26 {offsets = [0, 6], sizes = [8, 1], strides = [1, 1]} : vector<8x9xf32> to vector<8x1xf32>
    %65 = vector.shape_cast %64 : vector<8x1xf32> to vector<8x1x1xf32>
    %c0_36 = arith.constant 0 : index
    %c2_37 = arith.constant 2 : index
    %c0_38 = arith.constant 0 : index
    %66 = vector.load %arg12[%c0_36, %c2_37, %c0_38] : memref<8x10x10xf32, #tpu.memory_space<vmem>>, vector<8x8x8xf32>
    %67 = vector.broadcast %65 : vector<8x1x1xf32> to vector<8x8x8xf32>
    %68 = arith.mulf %66, %67 : vector<8x8x8xf32>
    %69 = arith.addf %63, %68 : vector<8x8x8xf32>
    %70 = vector.extract_strided_slice %26 {offsets = [0, 7], sizes = [8, 1], strides = [1, 1]} : vector<8x9xf32> to vector<8x1xf32>
    %71 = vector.shape_cast %70 : vector<8x1xf32> to vector<8x1x1xf32>
    %c0_39 = arith.constant 0 : index
    %c2_40 = arith.constant 2 : index
    %c1_41 = arith.constant 1 : index
    %72 = vector.load %arg12[%c0_39, %c2_40, %c1_41] : memref<8x10x10xf32, #tpu.memory_space<vmem>>, vector<8x8x8xf32>
    %73 = vector.broadcast %71 : vector<8x1x1xf32> to vector<8x8x8xf32>
    %74 = arith.mulf %72, %73 : vector<8x8x8xf32>
    %75 = arith.addf %69, %74 : vector<8x8x8xf32>
    %76 = vector.extract_strided_slice %26 {offsets = [0, 8], sizes = [8, 1], strides = [1, 1]} : vector<8x9xf32> to vector<8x1xf32>
    %77 = vector.shape_cast %76 : vector<8x1xf32> to vector<8x1x1xf32>
    %c0_42 = arith.constant 0 : index
    %c2_43 = arith.constant 2 : index
    %c2_44 = arith.constant 2 : index
    %78 = vector.load %arg12[%c0_42, %c2_43, %c2_44] : memref<8x10x10xf32, #tpu.memory_space<vmem>>, vector<8x8x8xf32>
    %79 = vector.broadcast %77 : vector<8x1x1xf32> to vector<8x8x8xf32>
    %80 = arith.mulf %78, %79 : vector<8x8x8xf32>
    %81 = arith.addf %75, %80 : vector<8x8x8xf32>
    %c0_45 = arith.constant 0 : index
    %c0_46 = arith.constant 0 : index
    %82 = vector.load %arg7[%c0_45, %c0_46] : memref<8x1xf32, #tpu.memory_space<vmem>>, vector<8x1xf32>
    %83 = vector.shape_cast %82 : vector<8x1xf32> to vector<8x1x1xf32>
    %84 = vector.broadcast %83 : vector<8x1x1xf32> to vector<8x8x8xf32>
    %85 = arith.mulf %81, %84 : vector<8x8x8xf32>
    %c0_47 = arith.constant 0 : index
    %c0_48 = arith.constant 0 : index
    %86 = vector.load %arg8[%c0_47, %c0_48] : memref<8x1xf32, #tpu.memory_space<vmem>>, vector<8x1xf32>
    %87 = vector.shape_cast %86 : vector<8x1xf32> to vector<8x1x1xf32>
    %88 = vector.broadcast %87 : vector<8x1x1xf32> to vector<8x8x8xf32>
    %89 = arith.addf %85, %88 : vector<8x8x8xf32>
    %cst_49 = arith.constant 3.000000e+00 : f32
    %90 = vector.broadcast %cst_49 : f32 to vector<8x8x8xf32>
    %91 = arith.addf %89, %90 : vector<8x8x8xf32>
    %cst_50 = arith.constant 0.000000e+00 : f32
    %cst_51 = arith.constant 6.000000e+00 : f32
    %92 = vector.broadcast %cst_50 : f32 to vector<8x8x8xf32>
    %93 = arith.maximumf %92, %91 : vector<8x8x8xf32>
    %94 = vector.broadcast %cst_51 : f32 to vector<8x8x8xf32>
    %95 = arith.minimumf %94, %93 : vector<8x8x8xf32>
    %96 = arith.mulf %89, %95 : vector<8x8x8xf32>
    %cst_52 = arith.constant 0.166666672 : f32
    %97 = vector.broadcast %cst_52 : f32 to vector<8x8x8xf32>
    %98 = arith.mulf %96, %97 : vector<8x8x8xf32>
    %c0_i32_53 = arith.constant 0 : i32
    %99 = arith.cmpi eq, %arg1, %c0_i32_53 : i32
    %100 = arith.extui %99 : i1 to i32
    %c0_i32_54 = arith.constant 0 : i32
    %101 = arith.cmpi ne, %100, %c0_i32_54 : i32
    scf.if %101 {
      %c0_63 = arith.constant 0 : index
      %c0_64 = arith.constant 0 : index
      %112 = vector.load %arg10[%c0_63, %c0_64] : memref<8x1xf32, #tpu.memory_space<vmem>>, vector<8x1xf32>
      %113 = vector.broadcast %112 : vector<8x1xf32> to vector<8x64xf32>
      %114 = arith.addf %2, %113 : vector<8x64xf32>
      %c0_65 = arith.constant 0 : index
      %c0_66 = arith.constant 0 : index
      %115 = vector.load %arg13[%c0_65, %c0_66] : memref<8x64xf32, #tpu.memory_space<vmem>>, vector<8x64xf32>
      tpu.vector_store %arg13[%c0_65, %c0_66], %114 {strides = array<i32>} : memref<8x64xf32, #tpu.memory_space<vmem>>, vector<8x64xf32>,
    } else {
    }
    %c0_55 = arith.constant 0 : index
    %c0_56 = arith.constant 0 : index
    %102 = vector.load %arg9[%c0_55, %c0_56] : memref<8x8xbf16, #tpu.memory_space<vmem>>, vector<8x8xbf16>
    %103 = vector.shape_cast %98 : vector<8x8x8xf32> to vector<8x64xf32>
    %104 = arith.truncf %103 : vector<8x64xf32> to vector<8x64xbf16>
    %cst_57 = arith.constant dense<0.000000e+00> : vector<8x64xf32>
    %105 = tpu.matmul %102, %104, %cst_57 {dimension_numbers = #tpu.dot_dimension_numbers<[0], [0], [1], [1], [0, 1, 1, 1], [], []>} : vector<8x8xbf16>, vector<8x64xbf16>, vector<8x64xf32> -> vector<8x64xf32>
    %c0_58 = arith.constant 0 : index
    %c0_59 = arith.constant 0 : index
    %106 = vector.load %arg13[%c0_58, %c0_59] : memref<8x64xf32, #tpu.memory_space<vmem>>, vector<8x64xf32>
    %107 = arith.addf %106, %105 : vector<8x64xf32>
    %c0_60 = arith.constant 0 : index
    %c0_61 = arith.constant 0 : index
    %108 = vector.load %arg13[%c0_60, %c0_61] : memref<8x64xf32, #tpu.memory_space<vmem>>, vector<8x64xf32>
    tpu.vector_store %arg13[%c0_60, %c0_61], %107 {strides = array<i32>} : memref<8x64xf32, #tpu.memory_space<vmem>>, vector<8x64xf32>,
    %c1_i32 = arith.constant 1 : i32
    %109 = arith.cmpi eq, %arg1, %c1_i32 : i32
    %110 = arith.extui %109 : i1 to i32
    %c0_i32_62 = arith.constant 0 : i32
    %111 = arith.cmpi ne, %110, %c0_i32_62 : i32
    scf.if %111 {
      %c0_63 = arith.constant 0 : index
      %c0_64 = arith.constant 0 : index
      %112 = vector.load %arg13[%c0_63, %c0_64] : memref<8x64xf32, #tpu.memory_space<vmem>>, vector<8x64xf32>
      %113 = vector.shape_cast %112 : vector<8x64xf32> to vector<1x8x8x8xf32>
      %c0_65 = arith.constant 0 : index
      %c0_66 = arith.constant 0 : index
      %c0_67 = arith.constant 0 : index
      %c0_68 = arith.constant 0 : index
      %114 = vector.load %arg11[%c0_65, %c0_66, %c0_67, %c0_68] : memref<1x8x8x8xf32, #tpu.memory_space<vmem>>, vector<1x8x8x8xf32>
      tpu.vector_store %arg11[%c0_65, %c0_66, %c0_67, %c0_68], %113 {strides = array<i32>} : memref<1x8x8x8xf32, #tpu.memory_space<vmem>>, vector<1x8x8x8xf32>,
    } else {
    }
    return
  }
  func.func @transform_0(%arg0: i32, %arg1: i32) -> (i32, i32, i32, i32) {
    %c0_i32 = arith.constant 0 : i32
    %c0_i32_0 = arith.constant 0 : i32
    %c0_i32_1 = arith.constant 0 : i32
    %c0_i32_2 = arith.constant 0 : i32
    return %arg0, %c0_i32, %c0_i32_0, %c0_i32_1 : i32, i32, i32, i32
  }
  func.func @transform_1(%arg0: i32, %arg1: i32) -> (i32, i32) {
    %c0_i32 = arith.constant 0 : i32
    %c0_i32_0 = arith.constant 0 : i32
    return %arg1, %c0_i32 : i32, i32
  }
  func.func @transform_2(%arg0: i32, %arg1: i32) -> (i32, i32) {
    %c0_i32 = arith.constant 0 : i32
    %c0_i32_0 = arith.constant 0 : i32
    return %arg1, %c0_i32 : i32, i32
  }
  func.func @transform_3(%arg0: i32, %arg1: i32) -> (i32, i32) {
    %c0_i32 = arith.constant 0 : i32
    %c0_i32_0 = arith.constant 0 : i32
    return %arg1, %c0_i32 : i32, i32
  }
  func.func @transform_4(%arg0: i32, %arg1: i32) -> (i32, i32) {
    %c0_i32 = arith.constant 0 : i32
    %c0_i32_0 = arith.constant 0 : i32
    return %arg1, %c0_i32 : i32, i32
  }
  func.func @transform_5(%arg0: i32, %arg1: i32) -> (i32, i32) {
    %c0_i32 = arith.constant 0 : i32
    %c0_i32_0 = arith.constant 0 : i32
    return %arg1, %c0_i32 : i32, i32
  }
  func.func @transform_6(%arg0: i32, %arg1: i32) -> (i32, i32) {
    %c0_i32 = arith.constant 0 : i32
    %c0_i32_0 = arith.constant 0 : i32
    return %arg1, %c0_i32 : i32, i32
  }
  func.func @transform_7(%arg0: i32, %arg1: i32) -> (i32, i32) {
    %c0_i32 = arith.constant 0 : i32
    %c0_i32_0 = arith.constant 0 : i32
    return %arg1, %c0_i32 : i32, i32
  }
  func.func @transform_8(%arg0: i32, %arg1: i32) -> (i32, i32) {
    %c0_i32 = arith.constant 0 : i32
    %c0_i32_0 = arith.constant 0 : i32
    %c0_i32_1 = arith.constant 0 : i32
    return %c0_i32, %c0_i32_0 : i32, i32
  }
  func.func @transform_9(%arg0: i32, %arg1: i32) -> (i32, i32, i32, i32) {
    %c0_i32 = arith.constant 0 : i32
    %c0_i32_0 = arith.constant 0 : i32
    %c0_i32_1 = arith.constant 0 : i32
    %c0_i32_2 = arith.constant 0 : i32
    return %arg0, %c0_i32, %c0_i32_0, %c0_i32_1 : i32, i32, i32, i32
  }
}

</mosaic_0001>

<bundles_post_ra>
// kernel: tpu_custom_call.1
= control target key start
LH: loop header
LB: loop body
LE: loop exit
PB: predicated region body
PF: predicated region fallthrough
CT: control target
= control target key end

     0   :  { %s4004_s0 = inlined_call_operand.hbm [shape: f32[2,8,8,8], index: 0, kind: input, shape index: {}]   ;;  %s4005_s1 = inlined_call_operand.vmem [shape: bf16[16,8], index: 1, kind: input, shape index: {}]   ;;  %s4006_s2 = inlined_call_operand.vmem [shape: f32[16,1], index: 2, kind: input, shape index: {}]   ;;  %s4007_s3 = inlined_call_operand.vmem [shape: f32[16,1], index: 3, kind: input, shape index: {}]   ;;  %s4008_s4 = inlined_call_operand.vmem [shape: f32[16,9], index: 4, kind: input, shape index: {}]   ;;  %s4009_s5 = inlined_call_operand.vmem [shape: f32[16,1], index: 5, kind: input, shape index: {}]   ;;  %s4010_s6 = inlined_call_operand.vmem [shape: f32[16,1], index: 6, kind: input, shape index: {}]   ;;  %s4011_s7 = inlined_call_operand.vmem [shape: bf16[16,8], index: 7, kind: input, shape index: {}]   ;;  %s4012_s8 = inlined_call_operand.vmem [shape: f32[8,1], index: 8, kind: input, shape index: {}]   ;;  %s4013_s9 = inlined_call_operand.hbm [shape: f32[2,8,8,8], index: 9, kind: output, shape index: {}]  }
   0x1   :  { %4039 = sst [smem:[#allocation26_spill]] %s4004_s0 }
   0x2   :  { %4040 = sst [smem:[#allocation27_spill]] %s4006_s2 }
   0x3   :  { %4041 = sst [smem:[#allocation28_spill]] %s4011_s7 }
   0x4   :  { %14 = vsyncpa [#allocation5], 0 }
   0x5   :  { %16 = vsyncpa [#allocation5 + $0x1], 0 }
   0x6   :  { %17 = vsyncpa [#allocation6], 0 }
   0x7   :  { %19 = vsyncpa [#allocation6 + $0x1], 0  ;;  %s3055_s30 = smov 0   ;;  %s3057_s10 = smov 0  }
   0x8   :  { %s3059_s11 = smov 0   ;;  %s3061_s12 = smov 0  }
   0x9   :  { %s3063_s13 = smov 0   ;;  %s3065_s14 = smov 0  }
   0xa   :  { %s3067_s15 = smov 0   ;;  %s3069_s16 = smov 0  }
   0xb LB: > { %4042 = sst [smem:[#allocation10_spill]] %s2930_s30  ;;  %s2627_s17 = sadd.s32 4294967295, %s2958_s16   ;;  %s2958_s16 = sphi %s3069_s16, %s25_s16   ;;  %s2954_s15 = sphi %s3067_s15, %s4096_s15   ;;  %s2950_s14 = sphi %s3065_s14, %s4095_s14   ;;  %s2946_s13 = sphi %s3063_s13, %s4094_s13   ;;  %s2942_s12 = sphi %s3061_s12, %s4093_s12   ;;  %s2938_s11 = sphi %s3059_s11, %s4099_s11   ;;  %s2934_s10 = sphi %s3057_s10, %s4098_s10   ;;  %s2930_s30 = sphi %s3055_s30, %s4097_s30  }
   0xc   : > { %4043 = sst [smem:[#allocation11_spill]] %s2950_s14  ;;  %s2628_s18 = sadd.s32 4294967294, %s2958_s16  }
   0xd   : > { %4044 = sst [smem:[#allocation12_spill]] %s2954_s15  ;;  %s34_s19 = sadd.s32 1, %s2950_s14 }
   0xe   : > { %s37_s20 = sadd.s32 1, %s2954_s15  ;;  %p35_p0 = scmp.ge.s32.totalorder %s34_s19, 2 }
   0xf   : > { %s44_s21 = sadd.s32 1, %s2938_s11  ;;  %p51_p1 = scmp.ne.s32.totalorder %s2938_s11, %s2934_s10 }
  0x10   : > { %p52_p2 = scmp.eq.s32.totalorder %s2958_s16, 0  ;;  %s4101_s19 = smov (%p35_p0, %s34_s19), 0 }
  0x11   : > { %4045 = sst [smem:[#allocation13_spill]] %s4101_s19  ;;  %s4103_s20 = smov (!%p35_p0, %s37_s20), %s2954_s15 }
  0x12   : > { %p3106_p3 = por %p52_p2, %p51_p1  ;;  %p57_p4 = scmp.ne.s32.totalorder %s2934_s10, %s2930_s30 }
  0x13   : > { %p39_p5 = scmp.ge.s32.totalorder %s4103_s20, 2  ;;  %p58_p6 = scmp.eq.s32.totalorder %s2627_s17, 0 }
  0x14   : > { %p284_p7 = scmp.eq.s32.totalorder %s2627_s17, 3  ;;  %p290_p8 = scmp.eq.s32.totalorder %s2628_s18, 3 }
  0x15   : > { %s4105_s20 = smov (%p39_p5, %s4103_s20), 0  ;;  %p3114_p9 = por %p58_p6, %p57_p4 }
  0x16   : > { %4047 = sst [smem:[#allocation14_spill]] %s4105_s20  ;;  %p3118_p10 = por %p284_p7, %p51_p1 }
  0x17   : > { %s41_s25 = ssub.s32 %s2954_s15, %s4105_s20  ;;  %p3124_p11 = por %p290_p8, %p57_p4 }
  0x18   : > { %s4049_s24 = scalar_select %p3118_p10, 1, 0 }
  0x19   : > { %s4050_s26 = scalar_select %p3124_p11, 1, 0 }
  0x1a   : > { %p42_p12 = scmp.eq.s32.totalorder %s41_s25, 0  ;;  %p2684_p13 = scmp.lt.s32.totalorder %s2958_s16, 4 }
  0x1b   : > { %s313_s27 = sand.u32 1, %s2938_s11   ;;  %s2654_s17 = sshll.u32 %s2954_s15, 10 }
  0x1c   : > { %s3131_s28 = scalar_select %p42_p12, %s2938_s11, %s44_s21  }
  0x1d   : > { %s2631_s29 = sshll.u32 %s313_s27, 6  ;;  %s4052_s0 = sld [smem:[#allocation26_spill]] }
  0x1e   : > { %4051 = sst [smem:[#allocation15_spill]] %s3131_s28  ;;  %s317_s20 = scalar_lea.vmem [#allocation4], %s2631_s29 }
  0x1f   : > { %s324_s30 = sshll.u32 %s317_s20, 4  ;;  %p3143_p0 = pnand %p2684_p13, %p3106_p3  ;;  %s3139_s30 = int_to_ptr.vmem [resolvable:$true] %s324_s30 }
  0x20   : > { %s3148_s21 = scalar_lea.sflag [#allocation5], %s313_s27 }
  0x21   : > { %p2832_p4 = pneg %p3143_p0 }
  0x23   : > { %s3137_s14 = scalar_lea.hbm %s4052_s0, %s2654_s17  ;;  %s2835_s22 = scalar_lea.hbm %s4052_s0, 2048 }
  0x24   : > { %s2830_s19 = scalar_lea.hbm %s3137_s14, 1024  ;;  %p2836_p3 = scmp.lt.u32.totalorder %s3137_s14, %s4052_s0 }
  0x25   : > { %p2831_p2 = scmp.ne.s32.totalorder %s3137_s14, %s2830_s19  ;;  %p2837_p7 = scmp.lt.u32.totalorder %s2835_s22, %s2830_s19 }
  0x26   : > { %p2839_p12 = scmp.lt.u32.totalorder %s2830_s19, %s3137_s14 }
  0x27   : > { %p2833_p5 = pnand %p2832_p4, %p2831_p2  ;;  %p2838_p8 = por %p2837_p7, %p2836_p3 }
  0x29   : > { %p2834_p6 = pneg %p2833_p5  ;;  %p2840_p13 = por %p2839_p12, %p2838_p8 }
  0x2b   : > { %p2841_p1 = pnand %p2840_p13, %p2834_p6 }
  0x2d   : > { %2844 = shalt.err (!%p2841_p1)
}
  0x2e   : > { %s2845_s27 = scalar_lea.vmem %s3139_s30, 1024  ;;  %s2960_s20 = smov [#allocation4]  }
  0x2f   : > { %p2846_p2 = scmp.ne.s32.totalorder %s3139_s30, %s2845_s27  ;;  %s2850_s29 = sshll.u32 %s2960_s20, 4  ;;  %s2851_s29 = int_to_ptr.vmem [resolvable:$false] %s2850_s29 }
  0x30   : > { %s2852_s17 = scalar_lea.vmem %s2851_s29, 2048  ;;  %p2853_p10 = scmp.lt.s32.totalorder %s3139_s30, %s2851_s29 }
  0x31   : > { %p2848_p5 = pnand %p2846_p2, %p2832_p4  ;;  %p2854_p3 = scmp.lt.s32.totalorder %s2852_s17, %s2845_s27 }
  0x33   : > { %p2849_p11 = pneg %p2848_p5  ;;  %p2855_p7 = por %p2854_p3, %p2853_p10 }
  0x35   : > { %p2856_p8 = pnand %p2855_p7, %p2849_p11 }
  0x37   : > { %2859 = shalt.err (!%p2856_p8)
}
  0x38   : > { %s2961_s19 = smov 128   ;;  %s2962_s22 = smov 8  }
  0x39   : > { %2679 = dma.hbm_to_vmem [thread:$0]  (!%p3143_p0), %s3137_s14, 1024, %s3139_s30, %s3148_s21, %s2961_s19, %s2961_s19, %s2962_s22  }
  0x3a   : > { %p381_p1 = scmp.lt.s32.totalorder %s2958_s16, 5  ;;  %p4054_p4 = scmp.ge.s32.totalorder %s2958_s16, 1 }
  0x3c   : > { %p382_p6 = pnand %p4054_p4, %p381_p1 }
  0x3e   : > { %385 = sbr.rel (%p382_p6) target bundleno = 1654 (0x676), region = 56 }
  0x45   : > { %s3180_s18 = sand.u32 1, %s2934_s10  }
  0x46   : > { %s4022_s27 = sshll.u32 %s3180_s18, 6  ;;  %s388_s20 = scalar_lea.sflag [#allocation5], %s3180_s18 }
  0x47   : > { %s391_s29 = scalar_lea.vmem [#allocation4], %s4022_s27 }
  0x48   : > { %2921 = dma.done.wait (%p3114_p9), %s388_s20, 1024  }
  0x49   : > { %2923 = vsyncadd (%p3114_p9), %s388_s20, 4294966272  ;;  %v496_v0 = vlaneseq  ;;  %v2963_v1 = vmov 1983009808   ;;  %v2964_v5 = vmov 1934713408   ;;  %p454_p9 = scmp.lt.s32.totalorder %s2942_s12, 1 }
  0x4a   : > { %v494_v2 = vunpack.c.l.s4 %v2963_v1  ;;  %v558_v6 = vunpack.c.l.s4 %v2964_v5  ;;  %v2795_v9 = vld [vmem:[%s391_s29] ss:$16 sps:$4 sm:$0xff]   ;;  %v2797_v10 = vld [vmem:[%s391_s29 + $0x4] ss:$16 sps:$4 sm:$0xff]   ;;  %v2798_v11 = vld [vmem:[%s391_s29 + $0x8] ss:$16 sps:$4 sm:$0xff]  }
  0x4b   : > { %v3190_v4 = vshrl.u32 %v496_v0, 7  ;;  %v2800_v12 = vld [vmem:[%s391_s29 + $0xc] ss:$16 sps:$4 sm:$0xff]   ;;  %v2801_v14 = vld [vmem:[%s391_s29 + $0x20] ss:$16 sps:$4 sm:$0xff]   ;;  %s4020_s30 = smov 8  }
  0x4c   : > { %v495_v3 = vunpack.c.0.s8 %v494_v2  ;;  %v559_v8 = vunpack.c.0.s8 %v558_v6  ;;  %v2803_v15 = vld [vmem:[%s391_s29 + $0x24] ss:$16 sps:$4 sm:$0xff]   ;;  %v2804_v16 = vld [vmem:[%s391_s29 + $0x28] ss:$16 sps:$4 sm:$0xff]   ;;  %v2806_v18 = vld [vmem:[%s391_s29 + $0x2c] ss:$16 sps:$4 sm:$0xff]  }
  0x4d   : > { %s4021_s14 = smov 24   ;;  %v4025_v47 = vmov 0.0   ;;  %s4018_s21 = smov 16   ;;  %vm2970_vm0 = vmmov 0   ;;  %v4027_v50 = vmov 0   ;;  %vm655_vm1 = vcmask 64512  }
  0x4e   : > { %v3193_v7 = vsub.s32 %v495_v3, %v3190_v4  ;;  %v3198_v19 = vsub.s32 %v559_v8, %v3190_v4  ;;  %2660 = vmatprep.subr.bf16.mxu0 %v4025_v47  ;;  %s3219_s23 = scalar_select %p454_p9, %s2942_s12, 1  ;;  %2662 = vmatprep.mubr.msk.bf16.mxu0 %vm2970_vm0, %v4025_v47  ;;  %vm657_vm2 = vcmask 130048   ;;  %vm659_vm3 = vcmask 195584  }
  0x4f   : > { %s4019_s17 = smov 32   ;;  %s4057_s7 = sld [smem:[#allocation28_spill]]  ;;  %2793 = vset.pattern.permute.xlu1 %v4027_v50  ;;  %2794 = vset.pattern.permute.xlu0 %v4027_v50  ;;  %vm661_vm4 = vcmask 261120   ;;  %vm663_vm5 = vcmask 326656   ;;  %vm665_vm6 = vcmask 392192   ;;  %vm667_vm7 = vcmask 457728  }
  0x50   : > { %4055 = vst [vmem:[#allocation16_spill] sm:$0xff] %v3193_v7  ;;  %v499_v13 = vrot.slane %v2795_v9, %v3193_v7  ;;  %v515_v17 = vrot.slane %v2798_v11, %v3193_v7  ;;  %4056 = vst [vmem:[#allocation17_spill] sm:$0xff] %v3198_v19  ;;  %v506_v20 = vrot.slane %v2797_v10, %v3193_v7  ;;  %s4023_s25 = sshll.u32 %s3219_s23, 2  ;;  %s3234_s29 = sshll.u32 %s3219_s23, 3  ;;  %vm674_vm8 = vcmask 1043456  }
  0x51   : > { %v522_v21 = vrot.slane %v2800_v12, %v3193_v7  ;;  %v531_v22 = vrot.slane %v2801_v14, %v3193_v7  ;;  %v547_v23 = vrot.slane %v2804_v16, %v3193_v7  ;;  %v538_v24 = vrot.slane %v2803_v15, %v3193_v7  ;;  %s4058_s2 = sld [smem:[#allocation27_spill]]  ;;  %s2972_s27 = smov 40  }
  0x52   : > { %v555_v25 = vcombine.low %v499_v13, %v515_v17  ;;  %v556_v26 = vcombine.high %v499_v13, %v515_v17  ;;  %v554_v27 = vrot.slane %v2806_v18, %v3193_v7  ;;  %s473_s15 = scalar_lea.vmem %s4009_s5, %s3234_s29  ;;  %s4060_s0 = sshll.u32 %s3219_s23, 2 }
  0x53   : > { %v571_v28 = vcombine.low %v506_v20, %v522_v21  ;;  %v587_v29 = vcombine.low %v531_v22, %v547_v23  ;;  %v588_v30 = vcombine.high %v531_v22, %v547_v23  ;;  %v572_v34 = vcombine.high %v506_v20, %v522_v21  ;;  %s4061_s23 = sshll.u32 %s3180_s18, 6  ;;  %p2645_p10 = scmp.ne.s32.totalorder %s2942_s12, 0 }
  0x54   : > { %v563_v31 = vrot.slane %v555_v25, %v3198_v19  ;;  %v570_v32 = vrot.slane %v556_v26, %v3198_v19  ;;  %v603_v33 = vcombine.low %v538_v24, %v554_v27  ;;  %v604_v38 = vcombine.high %v538_v24, %v554_v27 }
  0x55   : > { %v595_v35 = vrot.slane %v587_v29, %v3198_v19  ;;  %v602_v36 = vrot.slane %v588_v30, %v3198_v19  ;;  %v579_v37 = vrot.slane %v571_v28, %v3198_v19  ;;  %v586_v43 = vrot.slane %v572_v34, %v3198_v19  ;;  %s3229_s20 = scalar_lea.vmem %s4057_s7, %s4023_s25  ;;  %s2973_s25 = smov 48  }
  0x56   : > { %v611_v39 = vrot.slane %v603_v33, %v3198_v19  ;;  %v618_v46 = vrot.slane %v604_v38, %v3198_v19  ;;  %vm741_vm9 = vcmask (!%p2645_p10), 80896   ;;  %vm743_vm10 = vcmask (!%p2645_p10), 74752  }
  0x57   : > { %v620_v40 = vcombine.high %v563_v31, %v595_v35  ;;  %v619_v41 = vcombine.low %v563_v31, %v595_v35  ;;  %v622_v42 = vcombine.high %v570_v32, %v602_v36  ;;  %v621_v44 = vcombine.low %v570_v32, %v602_v36  ;;  %s461_s19 = scalar_lea.vmem %s4058_s2, %s3234_s29  ;;  %s2974_s2 = smov 56  }
  0x58   : > { %v623_v45 = vcombine.low %v579_v37, %v611_v39  ;;  %v624_v48 = vcombine.high %v579_v37, %v611_v39  ;;  %v625_v49 = vcombine.low %v586_v43, %v618_v46  ;;  %v626_v51 = vcombine.high %v586_v43, %v618_v46  ;;  %v718_v52 = vld [vmem:[%s461_s19] sm:$0xff]  ;;  %s3283_s19 = scalar_lea.vmem [#allocation7], %s4061_s23 }
  0x59   : > { %628 = vrot.lane.b32.xlu0 %v620_v40, %s4020_s30  ;;  %636 = vrot.lane.b32.xlu1 %v622_v42, %s4021_s14  ;;  %s465_s14 = scalar_lea.vmem %s4007_s3, %s3234_s29  ;;  %v2975_v23 = vmov (!%p2645_p10), 0.0  }
  0x5a   : > { %v725_v53 = vld [vmem:[%s465_s14] sm:$0xff]  ;;  %s457_s14 = scalar_lea.vmem %s4005_s1, %s4060_s0  ;;  %742 = vst.msk [vmem:[#allocation2] sm:$0xff] (!%p2645_p10), %vm741_vm9, %v2975_v23  ;;  %745 = vst.msk [vmem:[#allocation2 + $0x10] sm:$0xff] (!%p2645_p10), %vm741_vm9, %v2975_v23 }
  0x5b   : > { %v669_v8 = vld [vmem:[%s457_s14] sm:$0xf]  ;;  %747 = vst.msk [vmem:[#allocation2 + $0x20] sm:$0xff] (!%p2645_p10), %vm741_vm9, %v2975_v23  ;;  %749 = vst.msk [vmem:[#allocation2 + $0x30] sm:$0xff] (!%p2645_p10), %vm741_vm9, %v2975_v23 }
  0x5c   : > { %751 = vst.msk [vmem:[#allocation2 + $0x40] sm:$0xff] (!%p2645_p10), %vm741_vm9, %v2975_v23  ;;  %753 = vst.msk [vmem:[#allocation2 + $0x50] sm:$0xff] (!%p2645_p10), %vm741_vm9, %v2975_v23 }
  0x5d   : > { %632 = vrot.lane.b32.xlu0 %v621_v44, %s4018_s21  ;;  %640 = vrot.lane.b32.xlu1 %v623_v45, %s4019_s17  ;;  %s477_s17 = scalar_lea.vmem %s4010_s6, %s3234_s29  ;;  %755 = vst.msk [vmem:[#allocation2 + $0x60] sm:$0xff] (!%p2645_p10), %vm741_vm9, %v2975_v23  ;;  %757 = vst.msk [vmem:[#allocation2 + $0x70] sm:$0xff] (!%p2645_p10), %vm741_vm9, %v2975_v23 }
  0x5e   : > { %744 = vst.msk [vmem:[#allocation2 + $0x8] sm:$0x3] (!%p2645_p10), %vm743_vm10, %v2975_v23  ;;  %746 = vst.msk [vmem:[#allocation2 + $0x18] sm:$0x3] (!%p2645_p10), %vm743_vm10, %v2975_v23 }
  0x5f   : > { %748 = vst.msk [vmem:[#allocation2 + $0x28] sm:$0x3] (!%p2645_p10), %vm743_vm10, %v2975_v23  ;;  %750 = vst.msk [vmem:[#allocation2 + $0x38] sm:$0x3] (!%p2645_p10), %vm743_vm10, %v2975_v23 }
  0x60   : > { %752 = vst.msk [vmem:[#allocation2 + $0x48] sm:$0x3] (!%p2645_p10), %vm743_vm10, %v2975_v23  ;;  %754 = vst.msk [vmem:[#allocation2 + $0x58] sm:$0x3] (!%p2645_p10), %vm743_vm10, %v2975_v23 }
  0x61   : > { %644 = vrot.lane.b32.xlu0 %v624_v48, %s2972_s27  ;;  %648 = vrot.lane.b32.xlu1 %v625_v49, %s2973_s25  ;;  %756 = vst.msk [vmem:[#allocation2 + $0x68] sm:$0x3] (!%p2645_p10), %vm743_vm10, %v2975_v23  ;;  %758 = vst.msk [vmem:[#allocation2 + $0x78] sm:$0x3] (!%p2645_p10), %vm743_vm10, %v2975_v23 }
  0x65   : > { %652 = vrot.lane.b32.xlu0 %v626_v51, %s2974_s2  ;;  %721 = vperm.xlu1 %2793, %v718_v52  }
  0x69   : > { %728 = vperm.xlu0 %2794, %v725_v53  }
  0xcb   : > { %v629_v54 = vpop.permute.xlu0 %628  ;;  %v637_v55 = vpop.permute.xlu1 %636 }
  0xcc   : > { %v656_v56 = vsel %vm655_vm1, %v619_v41, %v629_v54 }
  0xcf   : > { %v633_v57 = vpop.permute.xlu0 %632  ;;  %v641_v58 = vpop.permute.xlu1 %640 }
  0xd0   : > { %v658_v59 = vsel %vm657_vm2, %v656_v56, %v633_v57 }
  0xd1   : > { %v660_v60 = vsel %vm659_vm3, %v658_v59, %v637_v55 }
  0xd2   : > { %v662_v61 = vsel %vm661_vm4, %v660_v60, %v641_v58 }
  0xd3   : > { %v645_v62 = vpop.permute.xlu0 %644  ;;  %v649_v0 = vpop.permute.xlu1 %648 }
  0xd4   : > { %v664_v63 = vsel %vm663_vm5, %v662_v61, %v645_v62 }
  0xd5   : > { %v666_v1 = vsel %vm665_vm6, %v664_v63, %v649_v0 }
  0xd7   : > { %v653_v2 = vpop.permute.xlu0 %652 }
  0xd8   : > { %v3268_v3 = vsel %vm667_vm7, %v666_v1, %v653_v2 }
  0xd9   : > { %4059 = vst [vmem:[#allocation18_spill] sm:$0xff] %v3268_v3  ;;  %v670_v5 = vpack.c.bf16 %v3268_v3, %v3268_v3 }
  0xdb   : > { %v676_v6 = vsel %vm674_vm8, %v670_v5, 0 }
  0xdc   : > { %2661 = vmatpush3.bf16.msra.mxu0 %v676_v6 }
  0xdf   : > { %2663 = vmatmul.mubr.msk.bf16.vlgmr.msra.gmra.mrb[0].mxu0 %vm655_vm1, %v669_v8 }
  0xe4   : > { %v722_v9 = vpop.permute.xlu1 %721 }
  0xe8   : > { %v729_v11 = vpop.permute.xlu0 %728 }
 0x1b2   : > { %v712_v10 = vpop.f32.mrb[0].mxu0 }
 0x1b3   : > { %v724_v12 = vmul.f32 %v722_v9, %v712_v10  ;;  %v2664_v13 = vpop.f32.mrb[1].mxu0 }
 0x1b4   : > { %v715_v14 = vpop.f32.mrb[2].mxu0 }
 0x1b5   : > { %v731_v15 = vadd.f32 %v729_v11, %v724_v12  ;;  %v2665_v16 = vpop.f32.mrb[3].mxu0 }
 0x1b7   : > { %v732_v17 = vadd.f32 3.0, %v731_v15 }
 0x1b9   : > { %v733_v18 = vmax.f32 %v732_v17, 0.0  ;;  %740 = sbr.rel (%p2645_p10) target bundleno = 448 (0x1c0), region = 64 }
 0x1bb   : > { %v734_v20 = vmin.f32 %v733_v18, 6.0 }
 0x1bd   : > { %v735_v21 = vmul.f32 %v734_v20, %v731_v15 }
 0x1bf   : > { %v3279_v22 = vmul.f32 0.16666667, %v735_v21 }
 0x1c0 PF: > { %2807 = vset.pattern.permute.xlu1 %v4027_v50  ;;  %s2976_s21 = smov 104   ;;  %s2977_s30 = smov 120   ;;  %v2978_v24 = vmov 1966171168   ;;  %v2979_v26 = vmov 1   ;;  %v3311_v32 = vsub.s32 0, %v3190_v4 }
 0x1c1   : > { %766 = vrot.lane.b32.xlu1 %v3279_v22, %s2976_s21  ;;  %760 = vrot.lane.b32.xlu0 %v3279_v22, %s2977_s30  ;;  %v962_v25 = vunpack.c.l.s4 %v2978_v24  ;;  %s4062_s7 = scalar_lea.vmem %s4008_s4, %s3234_s29  ;;  %s2980_s28 = smov 96   ;;  %v2985_v49 = vmov 2   ;;  %v2986_v54 = vmov 3   ;;  %v2987_v55 = vmov 4  }
 0x1c2   : > { %2808 = vset.pattern.permute.xlu0 %v2979_v26  ;;  %v958_v28 = vld [vmem:[%s4062_s7] sm:$0xff]  ;;  %s2981_s14 = smov 112   ;;  %s2982_s23 = smov 80   ;;  %v2988_v56 = vmov 5   ;;  %vm949_vm11 = vcmask 72712   ;;  %vm2033_vm12 = vcmask (!%p2645_p10), 523264  }
 0x1c3   : > { %v963_v27 = vunpack.c.0.s8 %v962_v25  ;;  %v960_v29 = vcombine.high %v958_v28, %v958_v28  ;;  %s2983_s21 = smov 88   ;;  %s2984_s30 = smov 72  }
 0x1c4   : > { %s2989_s22 = smov 1   ;;  %s2993_s0 = smov 127  }
 0x1c5   : > { %769 = vrot.lane.b32.xlu1 %v3279_v22, %s2980_s28  ;;  %763 = vrot.lane.b32.xlu0 %v3279_v22, %s2981_s14  ;;  %v3307_v30 = vsub.s32 %v963_v27, %v3190_v4  ;;  %s2994_s7 = smov 126  }
 0x1c7   : > { %v967_v31 = vrot.slane %v958_v28, %v3307_v30  ;;  %v974_v35 = vrot.slane %v960_v29, %v3307_v30 }
 0x1c9   : > { %775 = vrot.lane.b32.xlu1 %v3279_v22, %s2982_s23  ;;  %772 = vrot.lane.b32.xlu0 %v3279_v22, %s2983_s21  ;;  %v983_v33 = vrot.slane %v967_v31, %v3307_v30  ;;  %v975_v34 = vcombine.high %v967_v31, %v967_v31  ;;  %v976_v40 = vcombine.high %v974_v35, %v974_v35 }
 0x1ca   : > { %v990_v48 = vrot.slane %v974_v35, %v3307_v30 }
 0x1cb   : > { %v3318_v36 = vrot.slane %v983_v33, %v3311_v32  ;;  %v1005_v37 = vcombine.high %v983_v33, %v983_v33  ;;  %v997_v38 = vrot.slane %v975_v34, %v3307_v30  ;;  %v1004_v42 = vrot.slane %v976_v40, %v3307_v30 }
 0x1cc   : > { %v3351_v51 = vrot.slane %v990_v48, %v3311_v32  ;;  %v1006_v52 = vcombine.high %v990_v48, %v990_v48 }
 0x1cd   : > { %1050 = vperm.xlu1 %2807, %v3318_v36   ;;  %778 = vrot.lane.b32.xlu0 %v3279_v22, %s2984_s30  ;;  %v3324_v4 = vrot.slane %v1005_v37, %v3311_v32  ;;  %v1007_v39 = vcombine.high %v997_v38, %v997_v38  ;;  %v3334_v43 = vrot.slane %v1004_v42, %v3311_v32 }
 0x1ce   : > { %v1008_v44 = vcombine.high %v1004_v42, %v1004_v42  ;;  %v3345_v46 = vrot.slane %v997_v38, %v3311_v32  ;;  %v3356_v53 = vrot.slane %v1006_v52, %v3311_v32 }
 0x1cf   : > { %v3328_v41 = vrot.slane %v1007_v39, %v3311_v32 }
 0x1d0   : > { %v3339_v45 = vrot.slane %v1008_v44, %v3311_v32 }
 0x1d1   : > { %1058 = vperm.xlu1 %2807, %v3324_v4   ;;  %1106 = vperm.xlu0 %2808, %v3318_v36  }
 0x1d5   : > { %1062 = vperm.xlu1 %2807, %v3328_v41   ;;  %1118 = vperm.xlu0 %2808, %v3328_v41  }
 0x1d9   : > { %1070 = vperm.xlu1 %2807, %v3334_v43   ;;  %1126 = vperm.xlu0 %2808, %v3334_v43  }
 0x1dd   : > { %1078 = vperm.xlu1 %2807, %v3339_v45   ;;  %1134 = vperm.xlu0 %2808, %v3339_v45  }
 0x1e1   : > { %2809 = vset.pattern.permute.xlu1 %v2979_v26  ;;  %2811 = vset.pattern.permute.xlu0 %v2985_v49 }
 0x1e2   : > { %1110 = vperm.xlu1 %2809, %v3345_v46   ;;  %1198 = vperm.xlu0 %2811, %v3345_v46  }
 0x1e6   : > { %1114 = vperm.xlu1 %2809, %v3324_v4   ;;  %1210 = vperm.xlu0 %2811, %v3351_v51  }
 0x1ea   : > { %1122 = vperm.xlu1 %2809, %v3351_v51   ;;  %1218 = vperm.xlu0 %2811, %v3356_v53  }
 0x1ee   : > { %1130 = vperm.xlu1 %2809, %v3356_v53   ;;  %2812 = vset.pattern.permute.xlu0 %v2986_v54 }
 0x1ef   : > { %1282 = vperm.xlu0 %2812, %v3318_v36  }
 0x1f2   : > { %2810 = vset.pattern.permute.xlu1 %v2985_v49 }
 0x1f3   : > { %1194 = vperm.xlu1 %2810, %v3318_v36   ;;  %1294 = vperm.xlu0 %2812, %v3328_v41  }
 0x1f7   : > { %1202 = vperm.xlu1 %2810, %v3324_v4   ;;  %1302 = vperm.xlu0 %2812, %v3334_v43  }
 0x1fb   : > { %1206 = vperm.xlu1 %2810, %v3328_v41   ;;  %1310 = vperm.xlu0 %2812, %v3339_v45  }
 0x1ff   : > { %1214 = vperm.xlu1 %2810, %v3334_v43   ;;  %2815 = vset.pattern.permute.xlu0 %v2987_v55 }
 0x200   : > { %1342 = vperm.xlu0 %2815, %v3345_v46  }
 0x203   : > { %1222 = vperm.xlu1 %2810, %v3339_v45  }
 0x204   : > { %1354 = vperm.xlu0 %2815, %v3351_v51  }
 0x207   : > { %2813 = vset.pattern.permute.xlu1 %v2986_v54 }
 0x208   : > { %1286 = vperm.xlu1 %2813, %v3345_v46   ;;  %1362 = vperm.xlu0 %2815, %v3356_v53  }
 0x20c   : > { %1290 = vperm.xlu1 %2813, %v3324_v4   ;;  %2816 = vset.pattern.permute.xlu0 %v2988_v56 }
 0x20d   : > { %1426 = vperm.xlu0 %2816, %v3318_v36  }
 0x210   : > { %1298 = vperm.xlu1 %2813, %v3351_v51  }
 0x211   : > { %1438 = vperm.xlu0 %2816, %v3328_v41  }
 0x214   : > { %1306 = vperm.xlu1 %2813, %v3356_v53  }
 0x218   : > { %2814 = vset.pattern.permute.xlu1 %v2987_v55 }
 0x219   : > { %1338 = vperm.xlu1 %2814, %v3318_v36  }
 0x21d   : > { %1346 = vperm.xlu1 %2814, %v3324_v4  }
 0x221   : > { %1350 = vperm.xlu1 %2814, %v3328_v41  }
 0x225   : > { %1358 = vperm.xlu1 %2814, %v3334_v43  }
 0x229   : > { %1366 = vperm.xlu1 %2814, %v3339_v45  }
 0x22d   : > { %2817 = vset.pattern.permute.xlu1 %v2988_v56 }
 0x22e   : > { %1430 = vperm.xlu1 %2817, %v3345_v46  }
 0x232   : > { %1434 = vperm.xlu1 %2817, %v3324_v4  }
 0x233   : > { %v767_v57 = vpop.permute.xlu1 %766  ;;  %v761_v58 = vpop.permute.xlu0 %760 }
 0x234   : > { %v797_v0 = vcombine.low %v761_v58, %v767_v57  ;;  %v798_v15 = vcombine.high %v761_v58, %v767_v57 }
 0x236   : > { %v805_v6 = vrot.slane %v797_v0, %v3193_v7  ;;  %v812_v25 = vrot.slane %v798_v15, %v3193_v7  ;;  %v2992_v15 = vmov 8  }
 0x237   : > { %v770_v59 = vpop.permute.xlu1 %769  ;;  %v764_v60 = vpop.permute.xlu0 %763 }
 0x238   : > { %v781_v61 = vcombine.low %v3279_v22, %v764_v60  ;;  %v782_v10 = vcombine.high %v3279_v22, %v764_v60 }
 0x23a   : > { %v789_v1 = vrot.slane %v781_v61, %v3193_v7  ;;  %v796_v20 = vrot.slane %v782_v10, %v3193_v7  ;;  %v2990_v61 = vmov 6  }
 0x23b   : > { %v776_v62 = vpop.permute.xlu1 %775  ;;  %v773_v63 = vpop.permute.xlu0 %772 }
 0x23c   : > { %v813_v2 = vcombine.low %v770_v59, %v776_v62  ;;  %v845_v11 = vcombine.low %v789_v1, %v805_v6  ;;  %v814_v12 = vcombine.high %v770_v59, %v776_v62  ;;  %v846_v21 = vcombine.high %v789_v1, %v805_v6 }
 0x23d   : > { %v861_v31 = vcombine.low %v796_v20, %v812_v25  ;;  %v862_v40 = vcombine.high %v796_v20, %v812_v25  ;;  %v2991_v6 = vmov 7  }
 0x23e   : > { %v821_v13 = vrot.slane %v813_v2, %v3193_v7  ;;  %v828_v23 = vrot.slane %v814_v12, %v3193_v7  ;;  %v853_v24 = vrot.slane %v845_v11, %v3198_v19  ;;  %v860_v33 = vrot.slane %v846_v21, %v3198_v19 }
 0x23f   : > { %v779_v5 = vpop.permute.xlu0 %778  ;;  %v869_v42 = vrot.slane %v861_v31, %v3198_v19  ;;  %v876_v54 = vrot.slane %v862_v40, %v3198_v19 }
 0x240   : > { %v829_v8 = vcombine.low %v773_v63, %v779_v5  ;;  %v830_v9 = vcombine.high %v773_v63, %v779_v5 }
 0x242   : > { %v837_v14 = vrot.slane %v829_v8, %v3193_v7  ;;  %v844_v16 = vrot.slane %v830_v9, %v3193_v7 }
 0x244   : > { %v877_v17 = vcombine.low %v821_v13, %v837_v14  ;;  %v878_v18 = vcombine.high %v821_v13, %v837_v14  ;;  %v893_v26 = vcombine.low %v828_v23, %v844_v16  ;;  %v894_v34 = vcombine.high %v828_v23, %v844_v16 }
 0x246   : > { %v885_v22 = vrot.slane %v877_v17, %v3198_v19  ;;  %v892_v29 = vrot.slane %v878_v18, %v3198_v19  ;;  %v901_v39 = vrot.slane %v893_v26, %v3198_v19  ;;  %v908_v52 = vrot.slane %v894_v34, %v3198_v19 }
 0x248   : > { %v910_v27 = vcombine.high %v853_v24, %v885_v22  ;;  %v909_v28 = vcombine.low %v853_v24, %v885_v22  ;;  %v912_v37 = vcombine.high %v860_v33, %v892_v29  ;;  %v911_v38 = vcombine.low %v860_v33, %v892_v29 }
 0x249   : > { %v914_v48 = vcombine.high %v869_v42, %v901_v39  ;;  %v913_v49 = vcombine.low %v869_v42, %v901_v39  ;;  %v915_v56 = vcombine.low %v876_v54, %v908_v52  ;;  %v916_v59 = vcombine.high %v876_v54, %v908_v52 }
 0x24a   : > { %927 = vrot.lane.b32.xlu0 %v910_v27, %s2989_s22  ;;  %925 = vrot.lane.b32.xlu1 %v909_v28, %s2989_s22 }
 0x24c   : > { %v3400_v35 = vpop.permute.xlu1 %1050 }
 0x24e   : > { %931 = vrot.lane.b32.xlu0 %v912_v37, %s2989_s22  ;;  %929 = vrot.lane.b32.xlu1 %v911_v38, %s2989_s22 }
 0x250   : > { %v3404_v44 = vpop.permute.xlu1 %1058  ;;  %v3418_v60 = vpop.permute.xlu0 %1106 }
 0x252   : > { %935 = vrot.lane.b32.xlu0 %v914_v48, %s2989_s22  ;;  %933 = vrot.lane.b32.xlu1 %v913_v49, %s2989_s22 }
 0x254   : > { %v3408_v55 = vpop.permute.xlu1 %1062  ;;  %v3424_v63 = vpop.permute.xlu0 %1118 }
 0x256   : > { %1446 = vperm.xlu0 %2816, %v3334_v43   ;;  %937 = vrot.lane.b32.xlu1 %v915_v56, %s2989_s22 }
 0x258   : > { %v3411_v57 = vpop.permute.xlu1 %1070  ;;  %v3433_v2 = vpop.permute.xlu0 %1126 }
 0x25a   : > { %1454 = vperm.xlu0 %2816, %v3339_v45   ;;  %1442 = vperm.xlu1 %2817, %v3351_v51  }
 0x25c   : > { %v3415_v58 = vpop.permute.xlu1 %1078  ;;  %v3440_v8 = vpop.permute.xlu0 %1134 }
 0x25e   : > { %939 = vrot.lane.b32.xlu0 %v916_v59, %s2989_s22  ;;  %1450 = vperm.xlu1 %2817, %v3356_v53  }
 0x25f   : > { %2819 = vset.pattern.permute.xlu0 %v2990_v61 }
 0x261   : > { %v3420_v62 = vpop.permute.xlu1 %1110  ;;  %v3446_v10 = vpop.permute.xlu0 %1198 }
 0x262   : > { %1518 = vperm.xlu0 %2819, %v3345_v46   ;;  %2818 = vset.pattern.permute.xlu1 %v2990_v61 }
 0x263   : > { %1514 = vperm.xlu1 %2818, %v3318_v36  }
 0x265   : > { %v3426_v0 = vpop.permute.xlu1 %1114  ;;  %v3454_v13 = vpop.permute.xlu0 %1210 }
 0x266   : > { %1530 = vperm.xlu0 %2819, %v3351_v51  }
 0x267   : > { %1522 = vperm.xlu1 %2818, %v3324_v4  }
 0x269   : > { %v3430_v1 = vpop.permute.xlu1 %1122  ;;  %v3462_v16 = vpop.permute.xlu0 %1218 }
 0x26a   : > { %1538 = vperm.xlu0 %2819, %v3356_v53  }
 0x26b   : > { %1526 = vperm.xlu1 %2818, %v3328_v41  }
 0x26d   : > { %v3436_v5 = vpop.permute.xlu1 %1130 }
 0x26e   : > { %2820 = vset.pattern.permute.xlu0 %v2991_v6  ;;  %v3468_v18 = vpop.permute.xlu0 %1282 }
 0x26f   : > { %1570 = vperm.xlu0 %2820, %v3318_v36   ;;  %1534 = vperm.xlu1 %2818, %v3334_v43  }
 0x272   : > { %v3442_v9 = vpop.permute.xlu1 %1194  ;;  %v3477_v23 = vpop.permute.xlu0 %1294 }
 0x273   : > { %1582 = vperm.xlu0 %2820, %v3328_v41   ;;  %1542 = vperm.xlu1 %2818, %v3339_v45  }
 0x276   : > { %v3448_v11 = vpop.permute.xlu1 %1202  ;;  %v3485_v22 = vpop.permute.xlu0 %1302 }
 0x277   : > { %1590 = vperm.xlu0 %2820, %v3334_v43   ;;  %2821 = vset.pattern.permute.xlu1 %v2991_v6 }
 0x278   : > { %1574 = vperm.xlu1 %2821, %v3345_v46  }
 0x27a   : > { %v3452_v12 = vpop.permute.xlu1 %1206  ;;  %v3492_v26 = vpop.permute.xlu0 %1310 }
 0x27b   : > { %1598 = vperm.xlu0 %2820, %v3339_v45  }
 0x27c   : > { %1578 = vperm.xlu1 %2821, %v3324_v4  }
 0x27e   : > { %v3458_v14 = vpop.permute.xlu1 %1214 }
 0x27f   : > { %2823 = vset.pattern.permute.xlu0 %v2992_v15 }
 0x280   : > { %1662 = vperm.xlu0 %2823, %v3345_v46   ;;  %1586 = vperm.xlu1 %2821, %v3351_v51  }
 0x282   : > { %v3464_v17 = vpop.permute.xlu1 %1222 }
 0x284   : > { %1674 = vperm.xlu0 %2823, %v3351_v51   ;;  %1594 = vperm.xlu1 %2821, %v3356_v53  }
 0x287   : > { %v3470_v20 = vpop.permute.xlu1 %1286 }
 0x288   : > { %1682 = vperm.xlu0 %2823, %v3356_v53   ;;  %2822 = vset.pattern.permute.xlu1 %v2992_v15 }
 0x289   : > { %1658 = vperm.xlu1 %2822, %v3318_v36  }
 0x28b   : > { %v3474_v21 = vpop.permute.xlu1 %1290 }
 0x28c   : > { %2824 = vset.pattern.permute.xlu0 %v4027_v50 }
 0x28d   : > { %1054 = vperm.xlu0 %2824, %v3345_v46   ;;  %1666 = vperm.xlu1 %2822, %v3324_v4   ;;  %v3496_v46 = vpop.permute.xlu0 %1342 }
 0x28f   : > { %v3481_v24 = vpop.permute.xlu1 %1298 }
 0x291   : > { %1066 = vperm.xlu0 %2824, %v3351_v51   ;;  %1670 = vperm.xlu1 %2822, %v3328_v41   ;;  %v3500_v28 = vpop.permute.xlu0 %1354 }
 0x293   : > { %v3487_v25 = vpop.permute.xlu1 %1306 }
 0x294   : > { %4063 = vst [vmem:[#allocation19_spill] sm:$0xff] %v3487_v25 }
 0x295   : > { %1678 = vperm.xlu1 %2822, %v3334_v43   ;;  %v3504_v41 = vpop.permute.xlu0 %1362 }
 0x298   : > { %v3490_v36 = vpop.permute.xlu1 %1338 }
 0x299   : > { %v3510_v43 = vpop.permute.xlu0 %1426 }
 0x29c   : > { %v3494_v27 = vpop.permute.xlu1 %1346 }
 0x29d   : > { %v3514_v34 = vpop.permute.xlu0 %1438 }
 0x2a0   : > { %v3498_v4 = vpop.permute.xlu1 %1350 }
 0x2a4   : > { %v3502_v51 = vpop.permute.xlu1 %1358 }
 0x2a8   : > { %v3506_v29 = vpop.permute.xlu1 %1366 }
 0x2ad   : > { %v3508_v31 = vpop.permute.xlu1 %1430 }
 0x2b1   : > { %v3512_v33 = vpop.permute.xlu1 %1434 }
 0x2bc   : > { %v926_v37 = vpop.permute.xlu1 %925  ;;  %v928_v38 = vpop.permute.xlu0 %927 }
 0x2bd   : > { %950 = vst.msk [vmem:[#allocation2 + $0x1] sm:$0xff] %vm949_vm11, %v926_v37  ;;  %951 = vst.msk [vmem:[#allocation2 + $0x11] sm:$0xff] %vm949_vm11, %v928_v38 }
 0x2c0   : > { %v930_v39 = vpop.permute.xlu1 %929  ;;  %v932_v40 = vpop.permute.xlu0 %931 }
 0x2c1   : > { %952 = vst.msk [vmem:[#allocation2 + $0x21] sm:$0xff] %vm949_vm11, %v930_v39  ;;  %953 = vst.msk [vmem:[#allocation2 + $0x31] sm:$0xff] %vm949_vm11, %v932_v40 }
 0x2c4   : > { %v934_v42 = vpop.permute.xlu1 %933  ;;  %v936_v48 = vpop.permute.xlu0 %935  ;;  %v3520_v49 = vld [vmem:[#allocation2] sm:$0xff]  ;;  %v3522_v52 = vld [vmem:[#allocation2 + $0x10] sm:$0xff] }
 0x2c5   : > { %954 = vst.msk [vmem:[#allocation2 + $0x41] sm:$0xff] %vm949_vm11, %v934_v42  ;;  %955 = vst.msk [vmem:[#allocation2 + $0x51] sm:$0xff] %vm949_vm11, %v936_v48  ;;  %v1137_v54 = vmul.f32 %v3418_v60, %v3520_v49  ;;  %v1138_v56 = vmul.f32 %v3420_v62, %v3522_v52  ;;  %v1226_v42 = vmul.f32 %v3446_v10, %v3522_v52  ;;  %v3576_v10 = vld [vmem:[#allocation2 + $0x12] sm:$0xff] }
 0x2c6   : > { %v3602_v47 = vld [vmem:[#allocation2 + $0x11] sm:$0xff] }
 0x2c7   : > { %1153 = vrot.lane.b32.xlu1 %v1137_v54, %s2993_s0  ;;  %1155 = vrot.lane.b32.xlu0 %v1138_v56, %s2993_s0 }
 0x2c8   : > { %v938_v59 = vpop.permute.xlu1 %937  ;;  %v3532_v61 = vld [vmem:[#allocation2 + $0x20] sm:$0xff]  ;;  %v3534_v6 = vld [vmem:[#allocation2 + $0x30] sm:$0xff] }
 0x2c9   : > { %956 = vst.msk [vmem:[#allocation2 + $0x61] sm:$0xff] %vm949_vm11, %v938_v59  ;;  %v1139_v15 = vmul.f32 %v3426_v0, %v3532_v61  ;;  %v1140_v60 = vmul.f32 %v3424_v63, %v3534_v6  ;;  %v1228_v48 = vmul.f32 %v3452_v12, %v3534_v6 }
 0x2cb   : > { %1157 = vrot.lane.b32.xlu1 %v1139_v15, %s2993_s0  ;;  %1159 = vrot.lane.b32.xlu0 %v1140_v60, %s2993_s0  ;;  %v3581_v60 = vld [vmem:[#allocation2 + $0x2] sm:$0xff] }
 0x2cc   : > { %v3543_v62 = vld [vmem:[#allocation2 + $0x40] sm:$0xff]  ;;  %v3545_v37 = vld [vmem:[#allocation2 + $0x50] sm:$0xff] }
 0x2cd   : > { %v1141_v38 = vmul.f32 %v3430_v1, %v3543_v62  ;;  %v1142_v39 = vmul.f32 %v3433_v2, %v3545_v37  ;;  %v1230_v56 = vmul.f32 %v3458_v14, %v3545_v37  ;;  %v3630_v25 = vld [vmem:[#allocation2 + $0x51] sm:$0xff] }
 0x2cf   : > { %1161 = vrot.lane.b32.xlu1 %v1141_v38, %s2993_s0  ;;  %1163 = vrot.lane.b32.xlu0 %v1142_v39, %s2993_s0  ;;  %v3586_v39 = vld [vmem:[#allocation2 + $0x42] sm:$0xff] }
 0x2d0   : > { %v3553_v0 = vld [vmem:[#allocation2 + $0x60] sm:$0xff] }
 0x2d1   : > { %4064 = vst [vmem:[#allocation20_spill] sm:$0xff] %v3553_v0  ;;  %v1143_v63 = vmul.f32 %v3436_v5, %v3553_v0 }
 0x2d3   : > { %1165 = vrot.lane.b32.xlu1 %v1143_v63, %s2993_s0 }
 0x2d5   : > { %v3558_v40 = vpop.permute.xlu0 %1446 }
 0x2d7   : > { %1243 = vrot.lane.b32.xlu1 %v1226_v42, %s2994_s7 }
 0x2d9   : > { %v3563_v1 = vpop.permute.xlu1 %1442  ;;  %v3565_v2 = vpop.permute.xlu0 %1454 }
 0x2db   : > { %1247 = vrot.lane.b32.xlu1 %v1228_v48, %s2994_s7  ;;  %v3593_v48 = vld [vmem:[#allocation2 + $0x22] sm:$0xff] }
 0x2dd   : > { %v3570_v5 = vpop.permute.xlu1 %1450  ;;  %v940_v54 = vpop.permute.xlu0 %939 }
 0x2de   : > { %957 = vst.msk [vmem:[#allocation2 + $0x71] sm:$0xff] %vm949_vm11, %v940_v54 }
 0x2df   : > { %1251 = vrot.lane.b32.xlu1 %v1230_v56, %s2994_s7 }
 0x2e1   : > { %v1519_v59 = vpop.permute.xlu0 %1518 }
 0x2e2   : > { %v3579_v15 = vmul.f32 %v1519_v59, %v3576_v10  ;;  %v1515_v12 = vpop.permute.xlu1 %1514 }
 0x2e3   : > { %v3584_v38 = vmul.f32 %v1515_v12, %v3581_v60 }
 0x2e5   : > { %v1531_v63 = vpop.permute.xlu0 %1530  ;;  %v3588_v14 = vld [vmem:[#allocation2 + $0x70] sm:$0xff] }
 0x2e6   : > { %v3591_v42 = vmul.f32 %v1531_v63, %v3586_v39  ;;  %v1523_v54 = vpop.permute.xlu1 %1522  ;;  %v1232_v56 = vmul.f32 %v3464_v17, %v3588_v14  ;;  %v1144_v59 = vmul.f32 %v3588_v14, %v3440_v8  ;;  %v3606_v63 = vld [vmem:[#allocation2 + $0x62] sm:$0xff]  ;;  %v3611_v17 = vld [vmem:[#allocation2 + $0x32] sm:$0xff]  ;;  %v1370_v8 = vmul.f32 %v3496_v46, %v3602_v47 }
 0x2e7   : > { %v3600_v12 = vmul.f32 %v1523_v54, %v3593_v48  ;;  %v1225_v54 = vmul.f32 %v3442_v9, %v3520_v49  ;;  %v1227_v46 = vmul.f32 %v3448_v11, %v3532_v61  ;;  %v1374_v9 = vmul.f32 %v3630_v25, %v3502_v51 }
 0x2e8   : > { %1255 = vrot.lane.b32.xlu1 %v1232_v56, %s2994_s7  ;;  %1167 = vrot.lane.b32.xlu0 %v1144_v59, %s2993_s0  ;;  %v3620_v56 = vld [vmem:[#allocation2 + $0x31] sm:$0xff] }
 0x2e9   : > { %v1539_v50 = vpop.permute.xlu0 %1538  ;;  %v3624_v59 = vld [vmem:[#allocation2 + $0x52] sm:$0xff] }
 0x2ea   : > { %v3609_v19 = vmul.f32 %v1539_v50, %v3606_v63  ;;  %v1527_v7 = vpop.permute.xlu1 %1526 }
 0x2eb   : > { %v3618_v3 = vmul.f32 %v1527_v7, %v3611_v17 }
 0x2ec   : > { %4065 = vst [vmem:[#allocation21_spill] sm:$0xff] %v3609_v19  ;;  %1387 = vrot.lane.b32.xlu1 %v1370_v8, %s2993_s0  ;;  %1241 = vrot.lane.b32.xlu0 %v1225_v54, %s2994_s7  ;;  %v1372_v19 = vmul.f32 %v3498_v4, %v3620_v56  ;;  %v1229_v8 = vmul.f32 %v3454_v13, %v3543_v62  ;;  %v3641_v54 = vld [vmem:[#allocation2 + $0x71] sm:$0xff]  ;;  %v3649_v4 = vld [vmem:[#allocation2 + $0x1] sm:$0xff] }
 0x2ed   : > { %v1376_v11 = vmul.f32 %v3506_v29, %v3641_v54  ;;  %v1457_v13 = vmul.f32 %v3510_v43, %v3649_v4  ;;  %v1369_v51 = vmul.f32 %v3649_v4, %v3490_v36 }
 0x2ee   : > { %v1535_v50 = vpop.permute.xlu1 %1534 }
 0x2ef   : > { %v3633_v7 = vmul.f32 %v1535_v50, %v3624_v59  ;;  %v3657_v50 = vld [vmem:[#allocation2 + $0x21] sm:$0xff] }
 0x2f0   : > { %1391 = vrot.lane.b32.xlu1 %v1372_v19, %s2993_s0  ;;  %1245 = vrot.lane.b32.xlu0 %v1227_v46, %s2994_s7  ;;  %v1231_v19 = vmul.f32 %v3462_v16, %v3553_v0  ;;  %v1459_v16 = vmul.f32 %v3512_v33, %v3657_v50  ;;  %v1371_v29 = vmul.f32 %v3657_v50, %v3494_v27  ;;  %v3665_v46 = vld [vmem:[#allocation2 + $0x41] sm:$0xff] }
 0x2f1   : > { %4066 = vst [vmem:[#allocation22_spill] sm:$0xff] %v3633_v7  ;;  %v1461_v36 = vmul.f32 %v3563_v1, %v3665_v46  ;;  %v1373_v43 = vmul.f32 %v3665_v46, %v3500_v28  ;;  %v1458_v1 = vmul.f32 %v3508_v31, %v3602_v47  ;;  %v1462_v31 = vmul.f32 %v3558_v40, %v3630_v25 }
 0x2f2   : > { %v3677_v27 = vpop.permute.xlu1 %1542 }
 0x2f3   : > { %4068 = vst [vmem:[#allocation24_spill] sm:$0xff] %v3677_v27 }
 0x2f4   : > { %1395 = vrot.lane.b32.xlu1 %v1374_v9, %s2993_s0  ;;  %1249 = vrot.lane.b32.xlu0 %v1229_v8, %s2994_s7  ;;  %v3673_v9 = vld [vmem:[#allocation2 + $0x61] sm:$0xff]  ;;  %v1571_v8 = vpop.permute.xlu0 %1570 }
 0x2f5   : > { %4067 = vst [vmem:[#allocation23_spill] sm:$0xff] %v3673_v9  ;;  %v1463_v33 = vmul.f32 %v3570_v5, %v3673_v9  ;;  %v1460_v5 = vmul.f32 %v3514_v34, %v3620_v56 }
 0x2f8   : > { %1399 = vrot.lane.b32.xlu1 %v1376_v11, %s2993_s0  ;;  %1253 = vrot.lane.b32.xlu0 %v1231_v19, %s2994_s7  ;;  %v1375_v11 = vmul.f32 %v3673_v9, %v3504_v41  ;;  %v1583_v28 = vpop.permute.xlu0 %1582  ;;  %v1575_v19 = vpop.permute.xlu1 %1574 }
 0x2fc   : > { %1473 = vrot.lane.b32.xlu1 %v1457_v13, %s2994_s7  ;;  %1385 = vrot.lane.b32.xlu0 %v1369_v51, %s2993_s0  ;;  %v1602_v13 = vmul.f32 %v1575_v19, %v3576_v10  ;;  %v1591_v51 = vpop.permute.xlu0 %1590  ;;  %v1579_v41 = vpop.permute.xlu1 %1578 }
 0x300   : > { %1477 = vrot.lane.b32.xlu1 %v1459_v16, %s2994_s7  ;;  %1389 = vrot.lane.b32.xlu0 %v1371_v29, %s2993_s0  ;;  %v4069_v16 = vmov 0   ;;  %v1604_v29 = vmul.f32 %v1583_v28, %v3611_v17 }
 0x304   : > { %1481 = vrot.lane.b32.xlu1 %v1461_v36, %s2994_s7  ;;  %1393 = vrot.lane.b32.xlu0 %v1373_v43, %s2993_s0  ;;  %v1599_v36 = vpop.permute.xlu0 %1598  ;;  %v1606_v43 = vmul.f32 %v1591_v51, %v3624_v59 }
 0x308   : > { %1485 = vrot.lane.b32.xlu1 %v1463_v33, %s2994_s7  ;;  %1397 = vrot.lane.b32.xlu0 %v1375_v11, %s2993_s0  ;;  %v1464_v33 = vmul.f32 %v3565_v2, %v3641_v54  ;;  %v1587_v11 = vpop.permute.xlu1 %1586  ;;  %v1663_v19 = vpop.permute.xlu0 %1662 }
 0x30c   : > { %1686 = vperm.xlu1 %2822, %v3339_v45   ;;  %1475 = vrot.lane.b32.xlu0 %v1458_v1, %s2994_s7  ;;  %v1737_v45 = vld [vmem:[%s473_s15] sm:$0xff]  ;;  %v3711_v1 = vld [vmem:[#allocation2 + $0x72] sm:$0xff]  ;;  %v1595_v51 = vpop.permute.xlu1 %1594 }
 0x30d   : > { %v1746_v34 = vrot.slane %v1737_v45, %v3307_v30  ;;  %4070 = vst [vmem:[#allocation25_spill] sm:$0xff] %v3711_v1  ;;  %v1608_v28 = vmul.f32 %v1599_v36, %v3711_v1  ;;  %v1739_v2 = vcombine.high %v1737_v45, %v1737_v45 }
 0x30f   : > { %v1754_v40 = vcombine.high %v1746_v34, %v1746_v34  ;;  %v1753_v36 = vrot.slane %v1739_v2, %v3307_v30 }
 0x310   : > { %1619 = vrot.lane.b32.xlu1 %v1602_v13, %s2993_s0  ;;  %1479 = vrot.lane.b32.xlu0 %v1460_v5, %s2994_s7  ;;  %v1762_v5 = vrot.slane %v1746_v34, %v3307_v30  ;;  %v1659_v45 = vpop.permute.xlu1 %1658  ;;  %v1860_v34 = vld [vmem:[%s477_s17] sm:$0xff] }
 0x311   : > { %2825 = vset.pattern.permute.xlu1 %v4069_v16  ;;  %v1776_v13 = vrot.slane %v1754_v40, %v3307_v30  ;;  %v1601_v16 = vmul.f32 %v1571_v8, %v3581_v60  ;;  %v1605_v40 = vmul.f32 %v1587_v11, %v3586_v39  ;;  %v1755_v9 = vcombine.high %v1753_v36, %v1753_v36 }
 0x314   : > { %1483 = vrot.lane.b32.xlu0 %v1462_v31, %s2994_s7  ;;  %1623 = vrot.lane.b32.xlu1 %v1604_v29, %s2993_s0  ;;  %v1690_v31 = vmul.f32 %v1663_v19, %v3576_v10  ;;  %v1795_v29 = vrot.slane %v1776_v13, %v3311_v32  ;;  %v1769_v10 = vrot.slane %v1753_v36, %v3307_v30 }
 0x315   : > { %v1869_v19 = vrot.slane %v1860_v34, %v3307_v30 }
 0x317   : > { %v1885_v11 = vrot.slane %v1869_v19, %v3307_v30 }
 0x318   : > { %1487 = vrot.lane.b32.xlu0 %v1464_v33, %s2994_s7  ;;  %1627 = vrot.lane.b32.xlu1 %v1606_v43, %s2993_s0  ;;  %v1603_v43 = vmul.f32 %v1579_v41, %v3593_v48  ;;  %v3725_v33 = vpop.permute.xlu0 %1674  ;;  %v1807_v41 = vrot.slane %v1769_v10, %v3311_v32 }
 0x31c   : > { %1074 = vperm.xlu0 %2824, %v3356_v53   ;;  %1631 = vrot.lane.b32.xlu1 %v1608_v28, %s2993_s0  ;;  %v1784_v53 = vcombine.high %v1762_v5, %v1762_v5  ;;  %v1785_v28 = vcombine.high %v1769_v10, %v1769_v10  ;;  %v3739_v2 = vpop.permute.xlu0 %1682  ;;  %v1791_v10 = vrot.slane %v1762_v5, %v3311_v32 }
 0x31e   : > { %v1799_v8 = vrot.slane %v1784_v53, %v3311_v32  ;;  %v1815_v53 = vrot.slane %v1785_v28, %v3311_v32  ;;  %v1783_v28 = vrot.slane %v1755_v9, %v3307_v30  ;;  %v1081_v9 = vmul.f32 %v3520_v49, %v3400_v35 }
 0x320   : > { %1617 = vrot.lane.b32.xlu0 %v1601_v16, %s2993_s0  ;;  %1707 = vrot.lane.b32.xlu1 %v1690_v31, %s2994_s7  ;;  %v1667_v16 = vpop.permute.xlu1 %1666  ;;  %v1607_v31 = vmul.f32 %v1595_v51, %v3606_v63  ;;  %v1914_v51 = vrot.slane %v1885_v11, %v3311_v32 }
 0x324   : > { %1621 = vrot.lane.b32.xlu0 %v1603_v43, %s2993_s0  ;;  %1825 = vperm.xlu1 %2825, %v1795_v29   ;;  %v1862_v29 = vcombine.high %v1860_v34, %v1860_v34  ;;  %v1689_v43 = vmul.f32 %v1659_v45, %v3581_v60  ;;  %v1786_v34 = vcombine.high %v1776_v13, %v1776_v13 }
 0x325   : > { %v1877_v13 = vcombine.high %v1869_v19, %v1869_v19  ;;  %v1084_v19 = vmul.f32 %v3534_v6, %v3408_v55  ;;  %v1691_v55 = vmul.f32 %v1667_v16, %v3593_v48  ;;  %v1695_v48 = vmul.f32 %v3739_v2, %v3606_v63 }
 0x326   : > { %v1876_v0 = vrot.slane %v1862_v29, %v3307_v30  ;;  %v1803_v60 = vrot.slane %v1786_v34, %v3311_v32  ;;  %v1811_v29 = vrot.slane %v1783_v28, %v3311_v32 }
 0x327   : > { %v1899_v7 = vrot.slane %v1877_v13, %v3307_v30 }
 0x328   : > { %1625 = vrot.lane.b32.xlu0 %v1605_v40, %s2993_s0  ;;  %1829 = vperm.xlu1 %2825, %v1799_v8   ;;  %v1055_v8 = vpop.permute.xlu0 %1054  ;;  %v3746_v40 = vpop.permute.xlu1 %1670 }
 0x329   : > { %v1692_v63 = vmul.f32 %v3746_v40, %v3611_v17  ;;  %v1320_v17 = vmul.f32 %v3641_v54, %v3492_v26 }
 0x32c   : > { %1629 = vrot.lane.b32.xlu0 %v1607_v31, %s2993_s0  ;;  %1837 = vperm.xlu1 %2825, %v1807_v41   ;;  %v1907_v41 = vcombine.high %v1885_v11, %v1885_v11  ;;  %v1892_v31 = vrot.slane %v1876_v0, %v3307_v30  ;;  %v1067_v36 = vpop.permute.xlu0 %1066  ;;  %v3756_v45 = vpop.permute.xlu1 %1678  ;;  %v1082_v11 = vmul.f32 %v3522_v52, %v1055_v8 }
 0x32d   : > { %v1083_v52 = vmul.f32 %v3532_v61, %v3404_v44  ;;  %v1878_v44 = vcombine.high %v1876_v0, %v1876_v0 }
 0x32e   : > { %v1922_v5 = vrot.slane %v1907_v41, %v3311_v32 }
 0x330   : > { %1705 = vrot.lane.b32.xlu0 %v1689_v43, %s2994_s7  ;;  %1845 = vperm.xlu1 %2825, %v1815_v53   ;;  %v1930_v53 = vrot.slane %v1892_v31, %v3311_v32  ;;  %v1787_v43 = vcombine.high %v1783_v28, %v1783_v28 }
 0x332   : > { %v1819_v1 = vrot.slane %v1787_v43, %v3311_v32  ;;  %v1085_v43 = vmul.f32 %v3543_v62, %v1067_v36  ;;  %v1314_v36 = vmul.f32 %v3602_v47, %v3470_v20  ;;  %v1318_v47 = vmul.f32 %v3630_v25, %v3485_v22 }
 0x334   : > { %1821 = vperm.xlu0 %2824, %v1791_v10   ;;  %1944 = vperm.xlu1 %2825, %v1914_v51   ;;  %v1908_v10 = vcombine.high %v1892_v31, %v1892_v31 }
 0x336   : > { %v1938_v35 = vrot.slane %v1908_v10, %v3311_v32  ;;  %v1316_v10 = vmul.f32 %v3620_v56, %v3477_v23  ;;  %v1088_v23 = vmul.f32 %v3588_v14, %v3415_v58 }
 0x338   : > { %1833 = vperm.xlu0 %2824, %v1803_v60   ;;  %1952 = vperm.xlu1 %2825, %v1922_v5   ;;  %v1918_v60 = vrot.slane %v1899_v7, %v3311_v32  ;;  %v1909_v5 = vcombine.high %v1899_v7, %v1899_v7  ;;  %v1906_v7 = vrot.slane %v1878_v44, %v3307_v30 }
 0x339   : > { %v1154_v51 = vpop.permute.xlu1 %1153  ;;  %v1156_v34 = vpop.permute.xlu0 %1155 }
 0x33a   : > { %v3763_v41 = vadd.f32 %v1154_v51, %v1081_v9  ;;  %v1178_v27 = vadd.f32 %v1156_v34, %v1082_v11  ;;  %v1926_v11 = vrot.slane %v1909_v5, %v3311_v32 }
 0x33c   : > { %1841 = vperm.xlu0 %2824, %v1811_v29   ;;  %1960 = vperm.xlu1 %2825, %v1930_v53   ;;  %v1086_v29 = vmul.f32 %v3545_v37, %v3411_v57  ;;  %v1934_v57 = vrot.slane %v1906_v7, %v3311_v32  ;;  %v1910_v37 = vcombine.high %v1906_v7, %v1906_v7 }
 0x33d   : > { %v1158_v49 = vpop.permute.xlu1 %1157  ;;  %v1160_v8 = vpop.permute.xlu0 %1159 }
 0x33e   : > { %v1179_v28 = vadd.f32 %v1158_v49, %v1083_v52  ;;  %v1180_v31 = vadd.f32 %v1160_v8, %v1084_v19  ;;  %v1942_v30 = vrot.slane %v1910_v37, %v3311_v32  ;;  %v1694_v32 = vmul.f32 %v3756_v45, %v3624_v59 }
 0x33f   : > { %v1313_v59 = vmul.f32 %v3649_v4, %v3468_v18 }
 0x340   : > { %1849 = vperm.xlu0 %2824, %v1819_v1   ;;  %1968 = vperm.xlu1 %2825, %v1938_v35   ;;  %v1693_v1 = vmul.f32 %v3725_v33, %v3586_v39 }
 0x341   : > { %v1162_v61 = vpop.permute.xlu1 %1161  ;;  %v1164_v53 = vpop.permute.xlu0 %1163 }
 0x342   : > { %v1181_v6 = vadd.f32 %v1162_v61, %v1085_v43  ;;  %v1182_v13 = vadd.f32 %v1164_v53, %v1086_v29 }
 0x344   : > { %1948 = vperm.xlu0 %2824, %v1918_v60   ;;  %1709 = vrot.lane.b32.xlu1 %v1691_v55, %s2994_s7  ;;  %v1315_v60 = vmul.f32 %v3657_v50, %v3474_v21 }
 0x345   : > { %v3780_v62 = vpop.permute.xlu1 %1165 }
 0x348   : > { %1956 = vperm.xlu0 %2824, %v1926_v11   ;;  %1713 = vrot.lane.b32.xlu1 %v1693_v1, %s2994_s7 }
 0x349   : > { %v1244_v0 = vpop.permute.xlu1 %1243 }
 0x34a   : > { %v1266_v16 = vadd.f32 %v1244_v0, %v1178_v27 }
 0x34c   : > { %1964 = vperm.xlu0 %2824, %v1934_v57   ;;  %1717 = vrot.lane.b32.xlu1 %v1695_v48, %s2994_s7  ;;  %v1322_v39 = vadd.f32 %v1314_v36, %v1266_v16 }
 0x34d   : > { %v1248_v33 = vpop.permute.xlu1 %1247 }
 0x34e   : > { %v1268_v9 = vadd.f32 %v1248_v33, %v1180_v31 }
 0x350   : > { %1972 = vperm.xlu0 %2824, %v1942_v30   ;;  %v1324_v51 = vadd.f32 %v1316_v10, %v1268_v9 }
 0x351   : > { %v1252_v34 = vpop.permute.xlu1 %1251 }
 0x352   : > { %v1270_v27 = vadd.f32 %v1252_v34, %v1182_v13 }
 0x354   : > { %1711 = vrot.lane.b32.xlu0 %v1692_v63, %s2994_s7  ;;  %v1326_v20 = vadd.f32 %v1318_v47, %v1270_v27  ;;  %v4072_v27 = vld [vmem:[#allocation25_spill] sm:$0xff]  ;;  %v4073_v47 = vld [vmem:[#allocation24_spill] sm:$0xff] }
 0x358   : > { %1715 = vrot.lane.b32.xlu0 %v1694_v32, %s2994_s7 }
 0x35a   : > { %v1256_v56 = vpop.permute.xlu1 %1255  ;;  %v1168_v2 = vpop.permute.xlu0 %1167 }
 0x35b   : > { %v1184_v52 = vadd.f32 %v1168_v2, %v1088_v23 }
 0x35d   : > { %v1272_v19 = vadd.f32 %v1256_v56, %v1184_v52 }
 0x35e   : > { %v1388_v40 = vpop.permute.xlu1 %1387  ;;  %v1242_v22 = vpop.permute.xlu0 %1241 }
 0x35f   : > { %v1410_v25 = vadd.f32 %v1388_v40, %v1322_v39  ;;  %v1265_v35 = vadd.f32 %v1242_v22, %v3763_v41  ;;  %v1328_v49 = vadd.f32 %v1320_v17, %v1272_v19  ;;  %v1317_v41 = vmul.f32 %v3665_v46, %v3481_v24  ;;  %v4074_v17 = vld [vmem:[#allocation20_spill] sm:$0xff] }
 0x361   : > { %v1321_v45 = vadd.f32 %v1313_v59, %v1265_v35  ;;  %v4076_v59 = vld [vmem:[#allocation23_spill] sm:$0xff] }
 0x362   : > { %v1392_v8 = vpop.permute.xlu1 %1391  ;;  %v1246_v31 = vpop.permute.xlu0 %1245 }
 0x363   : > { %v1412_v58 = vadd.f32 %v1392_v8, %v1324_v51  ;;  %v1267_v14 = vadd.f32 %v1246_v31, %v1179_v28 }
 0x365   : > { %v1323_v5 = vadd.f32 %v1315_v60, %v1267_v14 }
 0x366   : > { %v1396_v43 = vpop.permute.xlu1 %1395  ;;  %v1250_v26 = vpop.permute.xlu0 %1249 }
 0x367   : > { %v1414_v54 = vadd.f32 %v1396_v43, %v1326_v20  ;;  %v1269_v29 = vadd.f32 %v1250_v26, %v1181_v6 }
 0x369   : > { %v1325_v44 = vadd.f32 %v1317_v41, %v1269_v29 }
 0x36a   : > { %v1400_v61 = vpop.permute.xlu1 %1399  ;;  %v1254_v53 = vpop.permute.xlu0 %1253 }
 0x36b   : > { %v1416_v18 = vadd.f32 %v1400_v61, %v1328_v49  ;;  %v4075_v49 = vld [vmem:[#allocation19_spill] sm:$0xff] }
 0x36e   : > { %v1474_v4 = vpop.permute.xlu1 %1473  ;;  %v1386_v55 = vpop.permute.xlu0 %1385 }
 0x36f   : > { %v1409_v13 = vadd.f32 %v1386_v55, %v1321_v45  ;;  %v1319_v45 = vmul.f32 %v4076_v59, %v4075_v49 }
 0x371   : > { %v1497_v11 = vadd.f32 %v1474_v4, %v1409_v13 }
 0x372   : > { %v1478_v28 = vpop.permute.xlu1 %1477  ;;  %v1390_v7 = vpop.permute.xlu0 %1389 }
 0x373   : > { %v1411_v1 = vadd.f32 %v1390_v7, %v1323_v5  ;;  %v1553_v21 = vadd.f32 %v3584_v38, %v1497_v11 }
 0x375   : > { %v1499_v50 = vadd.f32 %v1478_v28, %v1411_v1 }
 0x376   : > { %v1394_v57 = vpop.permute.xlu0 %1393  ;;  %v1482_v24 = vpop.permute.xlu1 %1481 }
 0x377   : > { %v1413_v37 = vadd.f32 %v1394_v57, %v1325_v44  ;;  %v3815_v6 = vadd.f32 %v3600_v12, %v1499_v50  ;;  %v4071_v12 = vld [vmem:[#allocation22_spill] sm:$0xff] }
 0x379   : > { %v1501_v46 = vadd.f32 %v1482_v24, %v1413_v37 }
 0x37a   : > { %v1398_v0 = vpop.permute.xlu0 %1397  ;;  %v1486_v10 = vpop.permute.xlu1 %1485 }
 0x37b   : > { %v3818_v48 = vadd.f32 %v3591_v42, %v1501_v46  ;;  %v1552_v42 = vmul.f32 %v4073_v47, %v4072_v27 }
 0x37e   : > { %v1476_v16 = vpop.permute.xlu0 %1475 }
 0x37f   : > { %v1498_v36 = vadd.f32 %v1476_v16, %v1410_v25 }
 0x381   : > { %v1554_v30 = vadd.f32 %v3579_v15, %v1498_v36 }
 0x382   : > { %v1480_v39 = vpop.permute.xlu0 %1479 }
 0x383   : > { %v1500_v33 = vadd.f32 %v1480_v39, %v1412_v58 }
 0x385   : > { %v3822_v38 = vadd.f32 %v3618_v3, %v1500_v33 }
 0x386   : > { %v1484_v9 = vpop.permute.xlu0 %1483 }
 0x387   : > { %v1502_v51 = vadd.f32 %v1484_v9, %v1414_v54  ;;  %v4077_v54 = vld [vmem:[#allocation21_spill] sm:$0xff] }
 0x389   : > { %v3825_v34 = vadd.f32 %v4071_v12, %v1502_v51 }
 0x38a   : > { %v1488_v63 = vpop.permute.xlu0 %1487 }
 0x38b   : > { %v1504_v20 = vadd.f32 %v1488_v63, %v1416_v18  ;;  %v1687_v32 = vpop.permute.xlu1 %1686 }
 0x38c   : > { %v1696_v23 = vmul.f32 %v1687_v32, %v4072_v27 }
 0x38d   : > { %v3830_v15 = vadd.f32 %v1552_v42, %v1504_v20 }
 0x38e   : > { %1719 = vrot.lane.b32.xlu0 %v1696_v23, %s2994_s7 }
 0x38f   : > { %v1620_v3 = vpop.permute.xlu1 %1619 }
 0x390   : > { %v1642_v46 = vadd.f32 %v1620_v3, %v1554_v30 }
 0x393   : > { %v3833_v56 = vpop.permute.xlu1 %1623 }
 0x397   : > { %v3835_v2 = vpop.permute.xlu1 %1627 }
 0x39b   : > { %v3837_v52 = vpop.permute.xlu1 %1631  ;;  %v1075_v19 = vpop.permute.xlu0 %1074 }
 0x39c   : > { %v1087_v40 = vmul.f32 %v4074_v17, %v1075_v19 }
 0x39e   : > { %v1183_v22 = vadd.f32 %v3780_v62, %v1087_v40 }
 0x39f   : > { %v1708_v25 = vpop.permute.xlu1 %1707  ;;  %v1618_v35 = vpop.permute.xlu0 %1617 }
 0x3a0   : > { %v1271_v8 = vadd.f32 %v1254_v53, %v1183_v22  ;;  %v1641_v62 = vadd.f32 %v1618_v35, %v1553_v21  ;;  %v1730_v39 = vadd.f32 %v1708_v25, %v1642_v46 }
 0x3a2   : > { %v1327_v31 = vadd.f32 %v1319_v45, %v1271_v8 }
 0x3a3   : > { %v1826_v58 = vpop.permute.xlu1 %1825  ;;  %v1622_v14 = vpop.permute.xlu0 %1621 }
 0x3a4   : > { %v1415_v60 = vadd.f32 %v1398_v0, %v1327_v31  ;;  %v1853_v21 = vmul.f32 %v1826_v58, %v1730_v39  ;;  %v1643_v9 = vadd.f32 %v1622_v14, %v3815_v6 }
 0x3a6   : > { %v1503_v5 = vadd.f32 %v1486_v10, %v1415_v60 }
 0x3a7   : > { %v1830_v43 = vpop.permute.xlu1 %1829  ;;  %v1626_v26 = vpop.permute.xlu0 %1625 }
 0x3a8   : > { %v1559_v29 = vadd.f32 %v4077_v54, %v1503_v5  ;;  %v1645_v27 = vadd.f32 %v1626_v26, %v3818_v48  ;;  %v1644_v26 = vadd.f32 %v3833_v56, %v3822_v38 }
 0x3ab   : > { %v1838_v41 = vpop.permute.xlu1 %1837  ;;  %v1630_v44 = vpop.permute.xlu0 %1629 }
 0x3ac   : > { %v1647_v19 = vadd.f32 %v1630_v44, %v1559_v29 }
 0x3af   : > { %v1846_v61 = vpop.permute.xlu1 %1845  ;;  %v1706_v18 = vpop.permute.xlu0 %1705 }
 0x3b0   : > { %v1729_v4 = vadd.f32 %v1706_v18, %v1641_v62 }
 0x3b3   : > { %v1945_v55 = vpop.permute.xlu1 %1944  ;;  %v1822_v13 = vpop.permute.xlu0 %1821 }
 0x3b4   : > { %v1852_v11 = vmul.f32 %v1822_v13, %v1729_v4 }
 0x3b6   : > { %v1975_v28 = vadd.f32 %v1945_v55, %v1852_v11  ;;  %v1646_v55 = vadd.f32 %v3835_v2, %v3825_v34  ;;  %v1648_v2 = vadd.f32 %v3837_v52, %v3830_v15  ;;  %v4078_v52 = vld [vmem:[#allocation18_spill] sm:$0xff] (!%p2645_p10) }
 0x3b7   : > { %v1953_v53 = vpop.permute.xlu1 %1952  ;;  %v1834_v7 = vpop.permute.xlu0 %1833 }
 0x3b8   : > { %v1983_v1 = vadd.f32 3.0, %v1975_v28 }
 0x3ba   : > { %v1991_v50 = vmax.f32 %v1983_v1, 0.0 }
 0x3bb   : > { %v1961_v57 = vpop.permute.xlu1 %1960  ;;  %v1842_v37 = vpop.permute.xlu0 %1841 }
 0x3bc   : > { %v1999_v24 = vmin.f32 %v1991_v50, 6.0 }
 0x3be   : > { %v2007_v0 = vmul.f32 %v1999_v24, %v1975_v28 }
 0x3bf   : > { %v1969_v16 = vpop.permute.xlu1 %1968  ;;  %v3844_v36 = vpop.permute.xlu0 %1849 }
 0x3c0   : > { %v3846_v33 = vmul.f32 0.16666667, %v2007_v0 }
 0x3c3   : > { %v1710_v10 = vpop.permute.xlu1 %1709  ;;  %v1949_v51 = vpop.permute.xlu0 %1948 }
 0x3c4   : > { %v1731_v12 = vadd.f32 %v1710_v10, %v1643_v9  ;;  %v1976_v63 = vadd.f32 %v1949_v51, %v1853_v21 }
 0x3c6   : > { %v1854_v47 = vmul.f32 %v1830_v43, %v1731_v12  ;;  %v1984_v42 = vadd.f32 3.0, %v1976_v63 }
 0x3c7   : > { %v1714_v20 = vpop.permute.xlu1 %1713  ;;  %v1957_v30 = vpop.permute.xlu0 %1956 }
 0x3c8   : > { %v1977_v32 = vadd.f32 %v1953_v53, %v1854_v47  ;;  %v1992_v23 = vmax.f32 %v1984_v42, 0.0  ;;  %v1733_v3 = vadd.f32 %v1714_v20, %v1645_v27 }
 0x3ca   : > { %v1985_v17 = vadd.f32 3.0, %v1977_v32  ;;  %v2000_v40 = vmin.f32 %v1992_v23, 6.0  ;;  %v1856_v22 = vmul.f32 %v1838_v41, %v1733_v3  ;;  %v2995_v23 = vmov (!%p2645_p10), 0  }
 0x3cb   : > { %v1718_v25 = vpop.permute.xlu1 %1717  ;;  %v1965_v35 = vpop.permute.xlu0 %1964  ;;  %2829 = vset.pattern.permute.xlu0 (!%p2645_p10), %v2995_v23 }
 0x3cc   : > { %v1993_v6 = vmax.f32 %v1985_v17, 0.0  ;;  %v2008_v49 = vmul.f32 %v2000_v40, %v1976_v63  ;;  %v1979_v59 = vadd.f32 %v1961_v57, %v1856_v22  ;;  %v1735_v45 = vadd.f32 %v1718_v25, %v1647_v19 }
 0x3ce   : > { %v2001_v8 = vmin.f32 %v1993_v6, 6.0  ;;  %v3850_v31 = vmul.f32 0.16666667, %v2008_v49  ;;  %v1987_v48 = vadd.f32 3.0, %v1979_v59  ;;  %v1858_v58 = vmul.f32 %v1846_v61, %v1735_v45 }
 0x3cf   : > { %v1973_v14 = vpop.permute.xlu0 %1972 }
 0x3d0   : > { %v2009_v60 = vmul.f32 %v2001_v8, %v1977_v32  ;;  %v1995_v5 = vmax.f32 %v1987_v48, 0.0  ;;  %v1981_v43 = vadd.f32 %v1969_v16, %v1858_v58  ;;  %v2026_v32 = vld [vmem:[%s4012_s8] sm:$0xff] (!%p2645_p10) }
 0x3d1   : > { %2029 = vperm.xlu0 (!%p2645_p10), %2829, %v2026_v32  }
 0x3d2   : > { %v3854_v54 = vmul.f32 0.16666667, %v2009_v60  ;;  %v2003_v29 = vmin.f32 %v1995_v5, 6.0  ;;  %v1989_v41 = vadd.f32 3.0, %v1981_v43 }
 0x3d3   : > { %v1712_v44 = vpop.permute.xlu0 %1711 }
 0x3d4   : > { %v2011_v18 = vmul.f32 %v2003_v29, %v1979_v59  ;;  %v1997_v62 = vmax.f32 %v1989_v41, 0.0  ;;  %v1732_v4 = vadd.f32 %v1712_v44, %v1644_v26 }
 0x3d6   : > { %v2019_v13 = vmul.f32 0.16666667, %v2011_v18  ;;  %v2005_v61 = vmin.f32 %v1997_v62, 6.0  ;;  %v1855_v11 = vmul.f32 %v1834_v7, %v1732_v4 }
 0x3d7   : > { %v1716_v28 = vpop.permute.xlu0 %1715 }
 0x3d8   : > { %v2013_v53 = vmul.f32 %v2005_v61, %v1981_v43  ;;  %v1978_v1 = vadd.f32 %v1957_v30, %v1855_v11  ;;  %v1734_v50 = vadd.f32 %v1716_v28, %v1646_v55 }
 0x3da   : > { %v2021_v57 = vmul.f32 0.16666667, %v2013_v53  ;;  %v1986_v38 = vadd.f32 3.0, %v1978_v1  ;;  %v1857_v56 = vmul.f32 %v1842_v37, %v1734_v50 }
 0x3dc   : > { %v1994_v24 = vmax.f32 %v1986_v38, 0.0  ;;  %v1980_v46 = vadd.f32 %v1965_v35, %v1857_v56 }
 0x3de   : > { %v2002_v0 = vmin.f32 %v1994_v24, 6.0  ;;  %v1988_v16 = vadd.f32 3.0, %v1980_v46 }
 0x3e0   : > { %v2010_v39 = vmul.f32 %v2002_v0, %v1978_v1  ;;  %v1996_v21 = vmax.f32 %v1988_v16, 0.0 }
 0x3e2   : > { %v2018_v9 = vmul.f32 0.16666667, %v2010_v39  ;;  %v2004_v10 = vmin.f32 %v1996_v21, 6.0 }
 0x3e4   : > { %v2012_v51 = vmul.f32 %v2004_v10, %v1980_v46 }
 0x3e6   : > { %v2020_v34 = vmul.f32 0.16666667, %v2012_v51 }
 0x400   : > { %v1720_v7 = vpop.permute.xlu0 %1719 }
 0x401   : > { %v1736_v12 = vadd.f32 %v1720_v7, %v1648_v2 }
 0x403   : > { %v1859_v63 = vmul.f32 %v3844_v36, %v1736_v12 }
 0x405   : > { %v1982_v27 = vadd.f32 %v1973_v14, %v1859_v63 }
 0x407   : > { %v1990_v47 = vadd.f32 3.0, %v1982_v27 }
 0x409   : > { %v1998_v37 = vmax.f32 %v1990_v47, 0.0  ;;  %2025 = sbr.rel (%p2645_p10) target bundleno = 1108 (0x454), region = 68 }
 0x40b   : > { %v2006_v42 = vmin.f32 %v1998_v37, 6.0 }
 0x40d   : > { %v2014_v20 = vmul.f32 %v2006_v42, %v1982_v27 }
 0x40f   : > { %v2022_v30 = vmul.f32 0.16666667, %v2014_v20 }
 0x450   : > { %v2030_v15 = vpop.permute.xlu0 %2029 }
 0x451   : > { %v2032_v36 = vadd.f32 %v2030_v15, %v4078_v52 }
 0x453   : > { %2034 = vst.msk [vmem:[#allocation3] sm:$0xff] %vm2033_vm12, %v2032_v36 }
 0x454 PF: > { %v2036_v3 = vcombine.low %v3846_v33, %v3854_v54  ;;  %v2052_v19 = vcombine.low %v3850_v31, %v2018_v9  ;;  %v2068_v17 = vcombine.low %v2019_v13, %v2021_v57  ;;  %v2084_v40 = vcombine.low %v2020_v34, %v2022_v30  ;;  %v4080_v59 = vld [vmem:[#allocation16_spill] sm:$0xff]  ;;  %v4081_v62 = vld [vmem:[#allocation17_spill] sm:$0xff]  ;;  %s4082_s21 = smov 24   ;;  %s4083_s30 = smov 8   ;;  %v2035_v39 = vld [vmem:[%s3229_s20] sm:$0xf] }
 0x455   : > { %v4079_v22 = vmov 0.0   ;;  %v2037_v25 = vcombine.high %v3846_v33, %v3854_v54  ;;  %v2053_v35 = vcombine.high %v3850_v31, %v2018_v9  ;;  %v2069_v6 = vcombine.high %v2019_v13, %v2021_v57  ;;  %s4084_s22 = smov 32   ;;  %s4085_s0 = smov 16  }
 0x456   : > { %2666 = vmatprep.subr.bf16.mxu1 %v4079_v22  ;;  %v2085_v49 = vcombine.high %v2020_v34, %v2022_v30  ;;  %2668 = vmatprep.mubr.msk.bf16.mxu1 %vm2970_vm0, %v4079_v22  ;;  %v2044_v45 = vrot.slane %v2036_v3, %v4080_v59  ;;  %v2060_v8 = vrot.slane %v2052_v19, %v4080_v59  ;;  %vm2272_vm13 = vcmask 523264   ;;  %p2648_p11 = scmp.ne.s32.totalorder %s2942_s12, 1 }
 0x457   : > { %v2076_v48 = vrot.slane %v2068_v17, %v4080_v59  ;;  %v2092_v58 = vrot.slane %v2084_v40, %v4080_v59  ;;  %v2051_v14 = vrot.slane %v2037_v25, %v4080_v59  ;;  %v2067_v60 = vrot.slane %v2053_v35, %v4080_v59  ;;  %s2999_s20 = smov (!%p2648_p11), 112   ;;  %s3000_s7 = smov (!%p2648_p11), 80  }
 0x458   : > { %v2083_v33 = vrot.slane %v2069_v6, %v4080_v59  ;;  %v2099_v31 = vrot.slane %v2085_v49, %v4080_v59  ;;  %v2101_v5 = vcombine.high %v2044_v45, %v2060_v8  ;;  %v2100_v26 = vcombine.low %v2044_v45, %v2060_v8  ;;  %s3001_s28 = smov (!%p2648_p11), 88   ;;  %s3002_s14 = smov (!%p2648_p11), 72  }
 0x459   : > { %v2133_v43 = vcombine.high %v2076_v48, %v2092_v58  ;;  %v2132_v54 = vcombine.low %v2076_v48, %v2092_v58  ;;  %v2116_v29 = vcombine.low %v2051_v14, %v2067_v60  ;;  %v2117_v44 = vcombine.high %v2051_v14, %v2067_v60  ;;  %v4086_v14 = vld [vmem:[#allocation16_spill] sm:$0xff] (!%p2648_p11) }
 0x45a   : > { %v2148_v41 = vcombine.low %v2083_v33, %v2099_v31  ;;  %v2149_v18 = vcombine.high %v2083_v33, %v2099_v31  ;;  %v2115_v4 = vrot.slane %v2101_v5, %v4081_v62  ;;  %v2108_v13 = vrot.slane %v2100_v26, %v4081_v62  ;;  %v2270_v15 = vld [vmem:[#allocation3] sm:$0xff] }
 0x45b   : > { %v2147_v55 = vrot.slane %v2133_v43, %v4081_v62  ;;  %v2140_v61 = vrot.slane %v2132_v54, %v4081_v62  ;;  %v2124_v11 = vrot.slane %v2116_v29, %v4081_v62  ;;  %v2131_v57 = vrot.slane %v2117_v44, %v4081_v62 }
 0x45c   : > { %v2156_v28 = vrot.slane %v2148_v41, %v4081_v62  ;;  %v2163_v24 = vrot.slane %v2149_v18, %v4081_v62 }
 0x45d   : > { %v2167_v53 = vcombine.high %v2115_v4, %v2147_v55  ;;  %v2165_v1 = vcombine.high %v2108_v13, %v2140_v61  ;;  %v2164_v50 = vcombine.low %v2108_v13, %v2140_v61  ;;  %v2166_v56 = vcombine.low %v2115_v4, %v2147_v55 }
 0x45e   : > { %v2168_v38 = vcombine.low %v2124_v11, %v2156_v28  ;;  %v2170_v46 = vcombine.low %v2131_v57, %v2163_v24  ;;  %v2169_v0 = vcombine.high %v2124_v11, %v2156_v28  ;;  %v2171_v16 = vcombine.high %v2131_v57, %v2163_v24  ;;  %v4087_v57 = vld [vmem:[#allocation17_spill] sm:$0xff] (!%p2648_p11) }
 0x45f   : > { %2181 = vrot.lane.b32.xlu1 %v2167_v53, %s4082_s21  ;;  %2173 = vrot.lane.b32.xlu0 %v2165_v1, %s4083_s30 }
 0x463   : > { %2185 = vrot.lane.b32.xlu1 %v2168_v38, %s4084_s22  ;;  %2177 = vrot.lane.b32.xlu0 %v2166_v56, %s4085_s0 }
 0x467   : > { %2193 = vrot.lane.b32.xlu1 %v2170_v46, %s2973_s25  ;;  %2189 = vrot.lane.b32.xlu0 %v2169_v0, %s2972_s27  ;;  %s2997_s27 = smov (!%p2648_p11), 120   ;;  %s2998_s25 = smov (!%p2648_p11), 96  }
 0x46b   : > { %2197 = vrot.lane.b32.xlu0 %v2171_v16, %s2974_s2  ;;  %s2996_s2 = smov (!%p2648_p11), 104  }
 0x48a   : > { %2208 = vxpose.xlu1.c.b16.start.end [1/1] (short) (narrow) %v2035_v39, 16 }
 0x4d1   : > { %v2182_v21 = vpop.permute.xlu1 %2181  ;;  %v2174_v9 = vpop.permute.xlu0 %2173 }
 0x4d2   : > { %v2200_v10 = vsel %vm655_vm1, %v2164_v50, %v2174_v9 }
 0x4d5   : > { %v2186_v51 = vpop.permute.xlu1 %2185  ;;  %v2178_v34 = vpop.permute.xlu0 %2177 }
 0x4d6   : > { %v2201_v2 = vsel %vm657_vm2, %v2200_v10, %v2178_v34 }
 0x4d7   : > { %v2202_v7 = vsel %vm659_vm3, %v2201_v2, %v2182_v21 }
 0x4d8   : > { %v2203_v12 = vsel %vm661_vm4, %v2202_v7, %v2186_v51 }
 0x4d9   : > { %v2190_v63 = vpop.permute.xlu0 %2189  ;;  %v2194_v27 = vpop.permute.xlu1 %2193 }
 0x4da   : > { %v2204_v47 = vsel %vm663_vm5, %v2203_v12, %v2190_v63 }
 0x4db   : > { %v2205_v42 = vsel %vm665_vm6, %v2204_v47, %v2194_v27 }
 0x4dd   : > { %v2198_v37 = vpop.permute.xlu0 %2197 }
 0x4de   : > { %v2206_v20 = vsel %vm667_vm7, %v2205_v42, %v2198_v37 }
 0x4df   : > { %v2207_v30 = vpack.c.bf16 %v2206_v20, %v2206_v20 }
 0x4e1   : > { %v2228_v32 = vsel %vm674_vm8, %v2207_v30, 0 }
 0x4e2   : > { %2667 = vmatpush3.bf16.msra.mxu1 %v2228_v32 }
 0x4f0   : > { %v2216_v23 = vpop.trf.xlu1 }
 0x4f1   : > { %2669 = vmatmul.mubr.msk.bf16.vlgmr.msra.gmra.mrb[0].mxu1 %vm655_vm1, %v2216_v23 }
 0x5c1   : > { %2277 = sbr.rel (%p2648_p11) target bundleno = 1628 (0x65c), region = 72 }
 0x5c4   : > { %v2264_v52 = vpop.f32.mrb[0].mxu1 }
 0x5c5   : > { %v2271_v36 = vadd.f32 %v2270_v15, %v2264_v52  ;;  %v2670_v3 = vpop.f32.mrb[1].mxu1 }
 0x5c6   : > { %v2267_v19 = vpop.f32.mrb[2].mxu1 }
 0x5c7   : > { %2273 = vst.msk [vmem:[#allocation3] sm:$0xff] %vm2272_vm13, %v2271_v36  ;;  %v2671_v17 = vpop.f32.mrb[3].mxu1 }
 0x5ce   : > { %v2278_v40 = vld [vmem:[#allocation3] sm:$0xff] }
 0x5cf   : > { %2286 = vrot.lane.b32.xlu1 %v2278_v40, %s2996_s2  ;;  %2280 = vrot.lane.b32.xlu0 %v2278_v40, %s2997_s27 }
 0x5d3   : > { %2289 = vrot.lane.b32.xlu1 %v2278_v40, %s2998_s25  ;;  %2283 = vrot.lane.b32.xlu0 %v2278_v40, %s2999_s20 }
 0x5d7   : > { %2295 = vrot.lane.b32.xlu1 %v2278_v40, %s3000_s7  ;;  %2292 = vrot.lane.b32.xlu0 %v2278_v40, %s3001_s28 }
 0x5db   : > { %2298 = vrot.lane.b32.xlu0 %v2278_v40, %s3002_s14 }
 0x641   : > { %v2287_v22 = vpop.permute.xlu1 %2286  ;;  %v2281_v25 = vpop.permute.xlu0 %2280 }
 0x642   : > { %v2317_v59 = vcombine.low %v2281_v25, %v2287_v22  ;;  %v2318_v58 = vcombine.high %v2281_v25, %v2287_v22 }
 0x644   : > { %v2325_v5 = vrot.slane %v2317_v59, %v4086_v14  ;;  %v2332_v41 = vrot.slane %v2318_v58, %v4086_v14 }
 0x645   : > { %v2290_v35 = vpop.permute.xlu1 %2289  ;;  %v2284_v6 = vpop.permute.xlu0 %2283 }
 0x646   : > { %v2301_v49 = vcombine.low %v2278_v40, %v2284_v6  ;;  %v2302_v45 = vcombine.high %v2278_v40, %v2284_v6 }
 0x648   : > { %v2309_v60 = vrot.slane %v2301_v49, %v4086_v14  ;;  %v2316_v43 = vrot.slane %v2302_v45, %v4086_v14 }
 0x649   : > { %v2296_v8 = vpop.permute.xlu1 %2295  ;;  %v2293_v48 = vpop.permute.xlu0 %2292 }
 0x64a   : > { %v2333_v33 = vcombine.low %v2290_v35, %v2296_v8  ;;  %v2334_v31 = vcombine.high %v2290_v35, %v2296_v8  ;;  %v2365_v44 = vcombine.low %v2309_v60, %v2325_v5  ;;  %v2366_v18 = vcombine.high %v2309_v60, %v2325_v5 }
 0x64b   : > { %v2381_v61 = vcombine.low %v2316_v43, %v2332_v41  ;;  %v2382_v11 = vcombine.high %v2316_v43, %v2332_v41 }
 0x64c   : > { %v2341_v62 = vrot.slane %v2333_v33, %v4086_v14  ;;  %v2348_v4 = vrot.slane %v2334_v31, %v4086_v14  ;;  %v2373_v38 = vrot.slane %v2365_v44, %v4087_v57  ;;  %v2380_v56 = vrot.slane %v2366_v18, %v4087_v57 }
 0x64d   : > { %v2299_v26 = vpop.permute.xlu0 %2298  ;;  %v2389_v39 = vrot.slane %v2381_v61, %v4087_v57  ;;  %v2396_v21 = vrot.slane %v2382_v11, %v4087_v57 }
 0x64e   : > { %v2349_v54 = vcombine.low %v2293_v48, %v2299_v26  ;;  %v2350_v29 = vcombine.high %v2293_v48, %v2299_v26 }
 0x650   : > { %v2357_v55 = vrot.slane %v2349_v54, %v4086_v14  ;;  %v2364_v13 = vrot.slane %v2350_v29, %v4086_v14 }
 0x652   : > { %v2397_v28 = vcombine.low %v2341_v62, %v2357_v55  ;;  %v2398_v53 = vcombine.high %v2341_v62, %v2357_v55  ;;  %v2413_v1 = vcombine.low %v2348_v4, %v2364_v13  ;;  %v2414_v50 = vcombine.high %v2348_v4, %v2364_v13 }
 0x654   : > { %v2405_v24 = vrot.slane %v2397_v28, %v4087_v57  ;;  %v2412_v46 = vrot.slane %v2398_v53, %v4087_v57  ;;  %v2421_v0 = vrot.slane %v2413_v1, %v4087_v57  ;;  %v2428_v16 = vrot.slane %v2414_v50, %v4087_v57 }
 0x656   : > { %v2429_v9 = vcombine.low %v2373_v38, %v2405_v24  ;;  %v2430_v10 = vcombine.high %v2373_v38, %v2405_v24  ;;  %v2431_v51 = vcombine.low %v2380_v56, %v2412_v46  ;;  %v2432_v34 = vcombine.high %v2380_v56, %v2412_v46 }
 0x657   : > { %v2433_v2 = vcombine.low %v2389_v39, %v2421_v0  ;;  %v2434_v7 = vcombine.high %v2389_v39, %v2421_v0  ;;  %v2435_v12 = vcombine.low %v2396_v21, %v2428_v16  ;;  %v2436_v63 = vcombine.high %v2396_v21, %v2428_v16 }
 0x658   : > { %2437 = vst.msk [vmem:[%s3283_s19] sm:$0xff] %vm655_vm1, %v2429_v9  ;;  %2438 = vst.msk [vmem:[%s3283_s19 + $0x8] sm:$0xff] %vm655_vm1, %v2430_v10 }
 0x659   : > { %2439 = vst.msk [vmem:[%s3283_s19 + $0x10] sm:$0xff] %vm655_vm1, %v2431_v51  ;;  %2440 = vst.msk [vmem:[%s3283_s19 + $0x18] sm:$0xff] %vm655_vm1, %v2432_v34 }
 0x65a   : > { %2441 = vst.msk [vmem:[%s3283_s19 + $0x20] sm:$0xff] %vm655_vm1, %v2433_v2  ;;  %2442 = vst.msk [vmem:[%s3283_s19 + $0x28] sm:$0xff] %vm655_vm1, %v2434_v7 }
 0x65b   : > { %2443 = vst.msk [vmem:[%s3283_s19 + $0x30] sm:$0xff] %vm655_vm1, %v2435_v12  ;;  %2444 = vst.msk [vmem:[%s3283_s19 + $0x38] sm:$0xff] %vm655_vm1, %v2436_v63 }
 0x65c PF: > { %s2655_s12 = sshll.u32 %s2946_s13, 10  ;;  %s2459_s17 = sshll.u32 %s3283_s19, 4  ;;  %s3949_s17 = int_to_ptr.vmem [resolvable:$true] %s2459_s17 }
 0x65d   : > { %s3946_s29 = scalar_lea.hbm %s4013_s9, %s2655_s12  ;;  %s2446_s21 = scalar_lea.sflag [#allocation6], %s3180_s18 }
 0x65e   : > { %s2860_s30 = scalar_lea.vmem %s3949_s17, 1024  ;;  %p4088_p12 = scmp.ne.s32.totalorder %s4049_s24, 0 }
 0x65f   : > { %p2861_p0 = scmp.ne.s32.totalorder %s3949_s17, %s2860_s30  ;;  %s3003_s22 = smov [#allocation7]  }
 0x660   : > { %s2864_s0 = sshll.u32 %s3003_s22, 4  ;;  %s2865_s0 = int_to_ptr.vmem [resolvable:$false] %s2864_s0 }
 0x661   : > { %p2862_p13 = pnand %p2861_p0, %p4088_p12  ;;  %s2866_s13 = scalar_lea.vmem %s2865_s0, 2048 }
 0x662   : > { %p2867_p5 = scmp.lt.s32.totalorder %s3949_s17, %s2865_s0  ;;  %p2868_p3 = scmp.lt.s32.totalorder %s2866_s13, %s2860_s30 }
 0x663   : > { %p2863_p2 = pneg %p2862_p13 }
 0x664   : > { %p2869_p7 = por %p2868_p3, %p2867_p5 }
 0x666   : > { %p2870_p8 = pnand %p2869_p7, %p2863_p2 }
 0x668   : > { %2873 = shalt.err (!%p2870_p8)
}
 0x669   : > { %s2874_s19 = scalar_lea.hbm %s3946_s29, 1024  ;;  %s2878_s25 = scalar_lea.hbm %s4013_s9, 2048 }
 0x66a   : > { %p2875_p1 = scmp.ne.s32.totalorder %s3946_s29, %s2874_s19  ;;  %p2879_p9 = scmp.lt.u32.totalorder %s3946_s29, %s4013_s9 }
 0x66b   : > { %p2880_p10 = scmp.lt.u32.totalorder %s2878_s25, %s2874_s19  ;;  %p2882_p0 = scmp.lt.u32.totalorder %s2874_s19, %s3946_s29 }
 0x66c   : > { %p2876_p4 = pnand %p2875_p1, %p4088_p12 }
 0x66d   : > { %p2881_p11 = por %p2880_p10, %p2879_p9 }
 0x66e   : > { %p2877_p6 = pneg %p2876_p4 }
 0x66f   : > { %p2883_p13 = por %p2882_p0, %p2881_p11 }
 0x671   : > { %p2884_p2 = pnand %p2883_p13, %p2877_p6 }
 0x673   : > { %2887 = shalt.err (!%p2884_p2)
}
 0x674   : > { %s3004_s28 = smov 128   ;;  %s4089_s14 = smov 8  }
 0x675   : > { %2674 = dma.vmem_to_hbm [thread:$0]  (%p4088_p12), %s3949_s17, 1024, %s3946_s29, %s2446_s21, %s3004_s28, %s3004_s28, %s4089_s14  }
 0x676 PF: > { %s4090_s12 = sld [smem:[#allocation10_spill]]  ;;  %p2685_p5 = scmp.ge.s32.totalorder %s2958_s16, 2 }
 0x677   : > { %p4091_p3 = scmp.ne.s32.totalorder %s4050_s26, 0 }
 0x679   : > { %p2681_p7 = pnand %p2685_p5, %p4091_p3 }
 0x67c   : > { %s2474_s15 = sand.u32 1, %s4090_s12  }
 0x67d   : > { %s2475_s23 = scalar_lea.sflag [#allocation6], %s2474_s15 }
 0x67e   : > { %2925 = dma.done.wait (!%p2681_p7), %s2475_s23, 1024  }
 0x67f   : > { %2927 = vsyncadd (!%p2681_p7), %s2475_s23, 4294966272  ;;  %s25_s16 = sadd.s32 1, %s2958_s16   ;;  %s4092_s24 = sld [smem:[#allocation15_spill]] }
 0x680   : > { %p22_p8 = scmp.ge.s32.totalorder %s25_s16, 6   ;;  %s4093_s12 = sld [smem:[#allocation11_spill]] }
 0x681   : > { %s4094_s13 = sld [smem:[#allocation12_spill]]  ;;  %s4095_s14 = sld [smem:[#allocation13_spill]] }
 0x682   : > { %s4096_s15 = sld [smem:[#allocation14_spill]]  ;;  %s4097_s30 = smov %s2934_s10 }
 0x683   : > { %s4098_s10 = smov %s2938_s11  ;;  %24 = sbr.rel (!%p22_p8) target bundleno = 11 (0xb), region = 134 }
 0x685   : > { %s4099_s11 = smov %s4092_s24 }
 0x68a   :  { %2480 = vsyncpa [#allocation5], 1 }
 0x68b   :  { %2482 = vsyncpa [#allocation5 + $0x1], 1 }
 0x68c   :  { %2483 = vsyncpa [#allocation6], 1 }
 0x68d   :  { %2485 = vsyncpa [#allocation6 + $0x1], 1 }

</bundles_post_ra>
